<compile_context>
chip_gen: v5e
topology: v5e:2x2
jax: 0.10.0
libtpu: 0.0.40
codegen_flags: <defaults>
</compile_context>

<pallas_src>
import numpy as np
import jax
import jax.numpy as jnp
from jax.experimental import pallas as pl
from jax.experimental.pallas import tpu as pltpu

# ---------------------------------------------------------------------------
# Model configuration (mirrors MsciModel.__init__)
# ---------------------------------------------------------------------------
_LAYERS = [6.727112318181705, 9.375593325632668, 8.538792791615048, 8.082130034481784]
_HIDDEN = [int(2 ** v) for v in _LAYERS]          # computed exactly like PyTorch
_BN_EPS = 1e-7
_SOFTPLUS_THRESHOLD = 20.0

_LANE = 128
_SUBLANE = 8


def _round_up(n, m):
    return ((n + m - 1) // m) * m


def _default_act_dtype():
    """bf16 inter-layer activations on chips with a bf16 VPU (v6e/v7x), f32 otherwise."""
    try:
        kind = jax.devices()[0].device_kind.lower()
    except Exception:
        return jnp.float32
    if "v6" in kind or "v7" in kind:
        return jnp.bfloat16
    return jnp.float32            # v5e & older: no bf16 VPU/EUP -> keep f32 elementwise


# ---------------------------------------------------------------------------
# Pallas kernel: fused (Linear-with-folded-BN -> activation) x 5
# ---------------------------------------------------------------------------
def _make_mlp_kernel(n_layers, act_dtype):
    def kernel(x_ref, *refs):
        """refs = (w0, b0, ..., w4, b4, o_ref).

        BN (eval mode) is pre-folded into the padded bf16 weights / f32 biases, so
        the kernel is a pure matmul -> activation chain. Output feature dims are
        padded to 128 multiples, so every matmul and store is lane-dense.
        """
        o_ref = refs[-1]
        wb = refs[:-1]

        h = x_ref[...]                                   # bf16 (large B) or f32 (tiny B)
        for li in range(n_layers):
            w_ref = wb[2 * li]
            b_ref = wb[2 * li + 1]
            # bf16 MXU matmul with f32 accumulation; weights already stored as bf16.
            z = jnp.dot(h.astype(jnp.bfloat16), w_ref[...],
                        preferred_element_type=jnp.float32) + b_ref[...]
            if li < n_layers - 1:
                # ReLU; carried dtype is bf16 on v6e/v7x (halves spill), f32 on v5e.
                h = jnp.maximum(z, 0.0).astype(act_dtype)
            else:
                # Softplus(beta=1, threshold=20); exp/log1p land on the EUP slot.
                h = jnp.where(z > _SOFTPLUS_THRESHOLD, z, jnp.log1p(jnp.exp(z)))
        o_ref[...] = h.astype(o_ref.dtype)
    return kernel


def msci_forward_pallas(x, fparams, *, tile_b=2048, act_dtype=None):
    """x: (B, input_channel). fparams: output of fold_and_pad_params."""
    B, d_in = x.shape
    ws, bs = fparams["ws"], fparams["bs"]
    assert d_in == fparams["in_dim"]
    out_pad = ws[-1].shape[1]
    out_dim = fparams["out_dim"]
    if act_dtype is None:
        act_dtype = _default_act_dtype()

    # --- batch tiling --------------------------------------------------------
    # bf16 input blocks need the sublane (2nd-to-last) block dim to be a multiple
    # of 16; keep the f32 path for tiny batches so no row padding is needed there.
    use_bf16_in = B >= 16
    in_dtype = jnp.bfloat16 if use_bf16_in else jnp.float32
    sub = 16 if use_bf16_in else _SUBLANE
    if B <= 256:
        TILE_B = _round_up(max(B, sub), sub)          # single grid step
    else:
        # >= 2 grid steps so both TensorCores run on v7x; cap at tile_b for VMEM.
        TILE_B = max(sub, min(int(tile_b), _round_up(-(-B // 2), sub)))
    B_pad = _round_up(B, TILE_B)

    x_in = x.astype(in_dtype)
    if B_pad != B:
        x_in = jnp.pad(x_in, ((0, B_pad - B), (0, 0)))   # zero rows, sliced off below

    flat_inputs = [x_in]
    in_specs = [pl.BlockSpec((TILE_B, d_in), lambda i: (i, 0))]   # d_in is full extent
    for w, b in zip(ws, bs):
        flat_inputs += [w, b]
        in_specs += [
            pl.BlockSpec(w.shape, lambda i: (0, 0)),   # weights stay VMEM-resident
            pl.BlockSpec(b.shape, lambda i: (0, 0)),
        ]

    # Cost estimate: lets XLA schedule neighboring ops around the custom call.
    flops = 2 * B_pad * sum(int(w.shape[0]) * int(w.shape[1]) for w in ws)
    transcendentals = 2 * B_pad * int(out_pad)                    # exp + log1p
    bytes_accessed = (int(x_in.size) * x_in.dtype.itemsize
                      + B_pad * int(out_pad) * 4
                      + sum(int(w.size) * 2 for w in ws)
                      + sum(int(b.size) * 4 for b in bs))
    cost = pl.CostEstimate(flops=flops, transcendentals=transcendentals,
                           bytes_accessed=bytes_accessed)

    # Raise the scoped-VMEM limit only for large tiles (covers v5e's 16 MiB default).
    vmem_limit = 64 * 1024 * 1024 if TILE_B >= 1024 else None
    cparams = pltpu.CompilerParams(
        dimension_semantics=("parallel",),            # megacore sharding on v7x
        vmem_limit_bytes=vmem_limit,
    )

    out = pl.pallas_call(
        _make_mlp_kernel(len(ws), act_dtype),
        out_shape=jax.ShapeDtypeStruct((B_pad, out_pad), jnp.float32),
        grid=(B_pad // TILE_B,),
        in_specs=in_specs,
        out_specs=pl.BlockSpec((TILE_B, out_pad), lambda i: (i, 0)),
        compiler_params=cparams,
        cost_estimate=cost,
    )(*flat_inputs)
    # Padded rows/columns are finite garbage (softplus(0)=ln 2 etc.) — always slice.
    return out[:B, :out_dim]


# ---------------------------------------------------------------------------
# Deterministic synthetic parameters (eval-mode BN stats) + one-time folding
# ---------------------------------------------------------------------------
def make_params(key, input_channel, output_channel):
    """Unfolded, f32 parameters mirroring the PyTorch module (eval mode)."""
    dims = [input_channel] + _HIDDEN + [output_channel]
    params = []
    for li in range(5):
        d_in, d_out = dims[li], dims[li + 1]
        key, k_g, k_b, k_rm, k_rv, k_w, k_wb = jax.random.split(key, 7)
        gamma = jax.random.uniform(k_g, (d_in,), jnp.float32, 0.5, 1.5)
        beta = 0.1 * jax.random.normal(k_b, (d_in,), jnp.float32)
        run_mean = 0.1 * jax.random.normal(k_rm, (d_in,), jnp.float32)
        run_var = jax.random.uniform(k_rv, (d_in,), jnp.float32, 0.5, 1.5)
        bound = 1.0 / np.sqrt(d_in)
        w = jax.random.uniform(k_w, (d_in, d_out), jnp.float32, -bound, bound)
        b = jax.random.uniform(k_wb, (d_out,), jnp.float32, -bound, bound)
        params.append(dict(gamma=gamma, beta=beta, mean=run_mean, var=run_var,
                           w=w, b=b))
    return params


def fold_and_pad_params(params):
    """Constant-fold eval-mode BN into the Linear and pad for lane-dense matmuls.

    W' = diag(bn_scale) @ W , b' = bn_shift @ W + b.
    Layer 0 keeps K = d_in (matches the unpadded x input); every layer's output
    dim (and subsequent K dims) is padded to a multiple of 128. Pads are exact
    zeros so padded channels stay 0 through the ReLU layers.
    """
    ws, bs = [], []
    prev_out_pad = None
    for li, p in enumerate(params):
        d_in, d_out = p["w"].shape
        inv_std = p["gamma"] / jnp.sqrt(p["var"] + _BN_EPS)
        bn_shift = p["beta"] - p["mean"] * inv_std
        w_f = inv_std[:, None] * p["w"]
        b_f = bn_shift @ p["w"] + p["b"]

        d_in_p = d_in if li == 0 else prev_out_pad
        d_out_p = _round_up(d_out, _LANE)
        w_pad = jnp.zeros((d_in_p, d_out_p), jnp.float32).at[:d_in, :d_out].set(w_f)
        b_pad = jnp.zeros((1, d_out_p), jnp.float32).at[0, :d_out].set(b_f)
        ws.append(w_pad.astype(jnp.bfloat16))
        bs.append(b_pad)
        prev_out_pad = d_out_p
    return dict(ws=ws, bs=bs,
                in_dim=params[0]["w"].shape[0],
                out_dim=params[-1]["w"].shape[1])


# ---------------------------------------------------------------------------
# Pure-JAX references for correctness checking
# ---------------------------------------------------------------------------
def msci_forward_reference_f32(x, params):
    """Exact module structure (BN -> Linear -> act), f32, highest precision."""
    h = x.astype(jnp.float32)
    n = len(params)
    for li, p in enumerate(params):
        inv_std = p["gamma"] / jnp.sqrt(p["var"] + _BN_EPS)
        h = h * inv_std + (p["beta"] - p["mean"] * inv_std)   # BatchNorm1d (eval)
        z = jnp.dot(h, p["w"], precision=jax.lax.Precision.HIGHEST) + p["b"]
        if li < n - 1:
            h = jnp.maximum(z, 0.0)
        else:
            h = jnp.where(z > _SOFTPLUS_THRESHOLD, z, jnp.log1p(jnp.exp(z)))
    return h


def msci_forward_reference_folded(x, fparams, act_dtype=jnp.float32):
    """Same folded/padded bf16 params and dtype schedule as the kernel (tight check)."""
    h = x.astype(jnp.float32)
    n = len(fparams["ws"])
    for li, (w, b) in enumerate(zip(fparams["ws"], fparams["bs"])):
        z = jnp.dot(h.astype(jnp.bfloat16), w, preferred_element_type=jnp.float32) + b
        if li < n - 1:
            h = jnp.maximum(z, 0.0).astype(act_dtype)
        else:
            h = jnp.where(z > _SOFTPLUS_THRESHOLD, z, jnp.log1p(jnp.exp(z)))
    return h[:, :fparams["out_dim"]]


# ---------------------------------------------------------------------------
if __name__ == "__main__":
    key = jax.random.PRNGKey(0)
    key, k_x, k_p = jax.random.split(key, 3)

    batch = 8
    input_channel = 32
    output_channel = 8

    x = jax.random.normal(k_x, (batch, input_channel), jnp.float32)
    params = make_params(k_p, input_channel, output_channel)
    fparams = fold_and_pad_params(params)
    act_dtype = _default_act_dtype()

    out = jax.block_until_ready(msci_forward_pallas(x, fparams, act_dtype=act_dtype))

    # 1) Tight check: kernel vs. pure-JAX with identical folded/padded bf16 params
    #    and the same activation-dtype schedule (verifies kernel mechanics/grid).
    ref_folded = jax.block_until_ready(
        msci_forward_reference_folded(x, fparams, act_dtype=act_dtype))
    np.testing.assert_allclose(np.asarray(out), np.asarray(ref_folded),
                               rtol=1e-4, atol=1e-4)

    # 2) Semantic check vs. the f32 unfolded PyTorch-style forward; tolerance
    #    reflects the intentional bf16 MXU inputs (the only precision change).
    ref_f32 = jax.block_until_ready(msci_forward_reference_f32(x, params))
    np.testing.assert_allclose(np.asarray(out), np.asarray(ref_f32),
                               rtol=5e-2, atol=5e-2)

    print("KERNEL_OK")
</pallas_src>

<mosaic_0001>
module attributes {stable_mosaic.version = 11 : i64} {
  func.func @kernel(%arg0: i32, %arg1: memref<8x32xf32, #tpu.memory_space<vmem>>, %arg2: memref<32x128xbf16, #tpu.memory_space<vmem>>, %arg3: memref<1x128xf32, #tpu.memory_space<vmem>>, %arg4: memref<128x768xbf16, #tpu.memory_space<vmem>>, %arg5: memref<1x768xf32, #tpu.memory_space<vmem>>, %arg6: memref<768x384xbf16, #tpu.memory_space<vmem>>, %arg7: memref<1x384xf32, #tpu.memory_space<vmem>>, %arg8: memref<384x384xbf16, #tpu.memory_space<vmem>>, %arg9: memref<1x384xf32, #tpu.memory_space<vmem>>, %arg10: memref<384x128xbf16, #tpu.memory_space<vmem>>, %arg11: memref<1x128xf32, #tpu.memory_space<vmem>>, %arg12: memref<8x128xf32, #tpu.memory_space<vmem>>) attributes {dimension_semantics = [#tpu.dimension_semantics<parallel>], iteration_bounds = array<i64: 1>, scalar_prefetch = 0 : i64, scratch_operands = 0 : i64, tpu.core_type = #tpu.core_type<tc>, window_params = [{transform_indices = @transform_0, window_bounds = array<i64: 8, 32>}, {pipeline_mode = #tpu.pipeline_mode<synchronous>, transform_indices = @transform_1, window_bounds = array<i64: 32, 128>}, {pipeline_mode = #tpu.pipeline_mode<synchronous>, transform_indices = @transform_2, window_bounds = array<i64: 1, 128>}, {pipeline_mode = #tpu.pipeline_mode<synchronous>, transform_indices = @transform_3, window_bounds = array<i64: 128, 768>}, {pipeline_mode = #tpu.pipeline_mode<synchronous>, transform_indices = @transform_4, window_bounds = array<i64: 1, 768>}, {pipeline_mode = #tpu.pipeline_mode<synchronous>, transform_indices = @transform_5, window_bounds = array<i64: 768, 384>}, {pipeline_mode = #tpu.pipeline_mode<synchronous>, transform_indices = @transform_6, window_bounds = array<i64: 1, 384>}, {pipeline_mode = #tpu.pipeline_mode<synchronous>, transform_indices = @transform_7, window_bounds = array<i64: 384, 384>}, {pipeline_mode = #tpu.pipeline_mode<synchronous>, transform_indices = @transform_8, window_bounds = array<i64: 1, 384>}, {pipeline_mode = #tpu.pipeline_mode<synchronous>, transform_indices = @transform_9, window_bounds = array<i64: 384, 128>}, {pipeline_mode = #tpu.pipeline_mode<synchronous>, transform_indices = @transform_10, window_bounds = array<i64: 1, 128>}, {transform_indices = @transform_11, window_bounds = array<i64: 8, 128>}]} {
    %c0 = arith.constant 0 : index
    %c0_0 = arith.constant 0 : index
    %0 = vector.load %arg1[%c0, %c0_0] : memref<8x32xf32, #tpu.memory_space<vmem>>, vector<8x32xf32>
    %1 = arith.truncf %0 : vector<8x32xf32> to vector<8x32xbf16>
    %c0_1 = arith.constant 0 : index
    %c0_2 = arith.constant 0 : index
    %2 = vector.load %arg2[%c0_1, %c0_2] : memref<32x128xbf16, #tpu.memory_space<vmem>>, vector<32x128xbf16>
    %cst = arith.constant dense<0.000000e+00> : vector<8x128xf32>
    %3 = tpu.matmul %1, %2, %cst {dimension_numbers = #tpu.dot_dimension_numbers<[1], [0], [0], [1], [0, 0, 1, 1], [], []>} : vector<8x32xbf16>, vector<32x128xbf16>, vector<8x128xf32> -> vector<8x128xf32>
    %c0_3 = arith.constant 0 : index
    %c0_4 = arith.constant 0 : index
    %4 = vector.load %arg3[%c0_3, %c0_4] : memref<1x128xf32, #tpu.memory_space<vmem>>, vector<1x128xf32>
    %5 = vector.broadcast %4 : vector<1x128xf32> to vector<8x128xf32>
    %6 = arith.addf %3, %5 : vector<8x128xf32>
    %cst_5 = arith.constant 0.000000e+00 : f32
    %7 = vector.broadcast %cst_5 : f32 to vector<8x128xf32>
    %8 = arith.maximumf %6, %7 : vector<8x128xf32>
    %9 = arith.truncf %8 : vector<8x128xf32> to vector<8x128xbf16>
    %c0_6 = arith.constant 0 : index
    %c0_7 = arith.constant 0 : index
    %10 = vector.load %arg4[%c0_6, %c0_7] : memref<128x768xbf16, #tpu.memory_space<vmem>>, vector<128x768xbf16>
    %cst_8 = arith.constant dense<0.000000e+00> : vector<8x768xf32>
    %11 = tpu.matmul %9, %10, %cst_8 {dimension_numbers = #tpu.dot_dimension_numbers<[1], [0], [0], [1], [0, 0, 1, 1], [], []>} : vector<8x128xbf16>, vector<128x768xbf16>, vector<8x768xf32> -> vector<8x768xf32>
    %c0_9 = arith.constant 0 : index
    %c0_10 = arith.constant 0 : index
    %12 = vector.load %arg5[%c0_9, %c0_10] : memref<1x768xf32, #tpu.memory_space<vmem>>, vector<1x768xf32>
    %13 = vector.broadcast %12 : vector<1x768xf32> to vector<8x768xf32>
    %14 = arith.addf %11, %13 : vector<8x768xf32>
    %cst_11 = arith.constant 0.000000e+00 : f32
    %15 = vector.broadcast %cst_11 : f32 to vector<8x768xf32>
    %16 = arith.maximumf %14, %15 : vector<8x768xf32>
    %17 = arith.truncf %16 : vector<8x768xf32> to vector<8x768xbf16>
    %c0_12 = arith.constant 0 : index
    %c0_13 = arith.constant 0 : index
    %18 = vector.load %arg6[%c0_12, %c0_13] : memref<768x384xbf16, #tpu.memory_space<vmem>>, vector<768x384xbf16>
    %cst_14 = arith.constant dense<0.000000e+00> : vector<8x384xf32>
    %19 = tpu.matmul %17, %18, %cst_14 {dimension_numbers = #tpu.dot_dimension_numbers<[1], [0], [0], [1], [0, 0, 1, 1], [], []>} : vector<8x768xbf16>, vector<768x384xbf16>, vector<8x384xf32> -> vector<8x384xf32>
    %c0_15 = arith.constant 0 : index
    %c0_16 = arith.constant 0 : index
    %20 = vector.load %arg7[%c0_15, %c0_16] : memref<1x384xf32, #tpu.memory_space<vmem>>, vector<1x384xf32>
    %21 = vector.broadcast %20 : vector<1x384xf32> to vector<8x384xf32>
    %22 = arith.addf %19, %21 : vector<8x384xf32>
    %cst_17 = arith.constant 0.000000e+00 : f32
    %23 = vector.broadcast %cst_17 : f32 to vector<8x384xf32>
    %24 = arith.maximumf %22, %23 : vector<8x384xf32>
    %25 = arith.truncf %24 : vector<8x384xf32> to vector<8x384xbf16>
    %c0_18 = arith.constant 0 : index
    %c0_19 = arith.constant 0 : index
    %26 = vector.load %arg8[%c0_18, %c0_19] : memref<384x384xbf16, #tpu.memory_space<vmem>>, vector<384x384xbf16>
    %cst_20 = arith.constant dense<0.000000e+00> : vector<8x384xf32>
    %27 = tpu.matmul %25, %26, %cst_20 {dimension_numbers = #tpu.dot_dimension_numbers<[1], [0], [0], [1], [0, 0, 1, 1], [], []>} : vector<8x384xbf16>, vector<384x384xbf16>, vector<8x384xf32> -> vector<8x384xf32>
    %c0_21 = arith.constant 0 : index
    %c0_22 = arith.constant 0 : index
    %28 = vector.load %arg9[%c0_21, %c0_22] : memref<1x384xf32, #tpu.memory_space<vmem>>, vector<1x384xf32>
    %29 = vector.broadcast %28 : vector<1x384xf32> to vector<8x384xf32>
    %30 = arith.addf %27, %29 : vector<8x384xf32>
    %cst_23 = arith.constant 0.000000e+00 : f32
    %31 = vector.broadcast %cst_23 : f32 to vector<8x384xf32>
    %32 = arith.maximumf %30, %31 : vector<8x384xf32>
    %33 = arith.truncf %32 : vector<8x384xf32> to vector<8x384xbf16>
    %c0_24 = arith.constant 0 : index
    %c0_25 = arith.constant 0 : index
    %34 = vector.load %arg10[%c0_24, %c0_25] : memref<384x128xbf16, #tpu.memory_space<vmem>>, vector<384x128xbf16>
    %cst_26 = arith.constant dense<0.000000e+00> : vector<8x128xf32>
    %35 = tpu.matmul %33, %34, %cst_26 {dimension_numbers = #tpu.dot_dimension_numbers<[1], [0], [0], [1], [0, 0, 1, 1], [], []>} : vector<8x384xbf16>, vector<384x128xbf16>, vector<8x128xf32> -> vector<8x128xf32>
    %c0_27 = arith.constant 0 : index
    %c0_28 = arith.constant 0 : index
    %36 = vector.load %arg11[%c0_27, %c0_28] : memref<1x128xf32, #tpu.memory_space<vmem>>, vector<1x128xf32>
    %37 = vector.broadcast %36 : vector<1x128xf32> to vector<8x128xf32>
    %38 = arith.addf %35, %37 : vector<8x128xf32>
    %cst_29 = arith.constant 2.000000e+01 : f32
    %39 = vector.broadcast %cst_29 : f32 to vector<8x128xf32>
    %40 = arith.cmpf ogt, %38, %39 : vector<8x128xf32>
    %41 = math.exp %38 : vector<8x128xf32>
    %42 = math.log1p %41 : vector<8x128xf32>
    %43 = arith.select %40, %38, %42 : vector<8x128xi1>, vector<8x128xf32>
    %c0_30 = arith.constant 0 : index
    %c0_31 = arith.constant 0 : index
    %44 = vector.load %arg12[%c0_30, %c0_31] : memref<8x128xf32, #tpu.memory_space<vmem>>, vector<8x128xf32>
    tpu.vector_store %arg12[%c0_30, %c0_31], %43 {strides = array<i32>} : memref<8x128xf32, #tpu.memory_space<vmem>>, vector<8x128xf32>,
    return
  }
  func.func @transform_0(%arg0: i32) -> (i32, i32) {
    %c0_i32 = arith.constant 0 : i32
    %c0_i32_0 = arith.constant 0 : i32
    return %arg0, %c0_i32 : i32, i32
  }
  func.func @transform_1(%arg0: i32) -> (i32, i32) {
    %c0_i32 = arith.constant 0 : i32
    %c0_i32_0 = arith.constant 0 : i32
    %c0_i32_1 = arith.constant 0 : i32
    return %c0_i32, %c0_i32_0 : i32, i32
  }
  func.func @transform_2(%arg0: i32) -> (i32, i32) {
    %c0_i32 = arith.constant 0 : i32
    %c0_i32_0 = arith.constant 0 : i32
    %c0_i32_1 = arith.constant 0 : i32
    return %c0_i32, %c0_i32_0 : i32, i32
  }
  func.func @transform_3(%arg0: i32) -> (i32, i32) {
    %c0_i32 = arith.constant 0 : i32
    %c0_i32_0 = arith.constant 0 : i32
    %c0_i32_1 = arith.constant 0 : i32
    return %c0_i32, %c0_i32_0 : i32, i32
  }
  func.func @transform_4(%arg0: i32) -> (i32, i32) {
    %c0_i32 = arith.constant 0 : i32
    %c0_i32_0 = arith.constant 0 : i32
    %c0_i32_1 = arith.constant 0 : i32
    return %c0_i32, %c0_i32_0 : i32, i32
  }
  func.func @transform_5(%arg0: i32) -> (i32, i32) {
    %c0_i32 = arith.constant 0 : i32
    %c0_i32_0 = arith.constant 0 : i32
    %c0_i32_1 = arith.constant 0 : i32
    return %c0_i32, %c0_i32_0 : i32, i32
  }
  func.func @transform_6(%arg0: i32) -> (i32, i32) {
    %c0_i32 = arith.constant 0 : i32
    %c0_i32_0 = arith.constant 0 : i32
    %c0_i32_1 = arith.constant 0 : i32
    return %c0_i32, %c0_i32_0 : i32, i32
  }
  func.func @transform_7(%arg0: i32) -> (i32, i32) {
    %c0_i32 = arith.constant 0 : i32
    %c0_i32_0 = arith.constant 0 : i32
    %c0_i32_1 = arith.constant 0 : i32
    return %c0_i32, %c0_i32_0 : i32, i32
  }
  func.func @transform_8(%arg0: i32) -> (i32, i32) {
    %c0_i32 = arith.constant 0 : i32
    %c0_i32_0 = arith.constant 0 : i32
    %c0_i32_1 = arith.constant 0 : i32
    return %c0_i32, %c0_i32_0 : i32, i32
  }
  func.func @transform_9(%arg0: i32) -> (i32, i32) {
    %c0_i32 = arith.constant 0 : i32
    %c0_i32_0 = arith.constant 0 : i32
    %c0_i32_1 = arith.constant 0 : i32
    return %c0_i32, %c0_i32_0 : i32, i32
  }
  func.func @transform_10(%arg0: i32) -> (i32, i32) {
    %c0_i32 = arith.constant 0 : i32
    %c0_i32_0 = arith.constant 0 : i32
    %c0_i32_1 = arith.constant 0 : i32
    return %c0_i32, %c0_i32_0 : i32, i32
  }
  func.func @transform_11(%arg0: i32) -> (i32, i32) {
    %c0_i32 = arith.constant 0 : i32
    %c0_i32_0 = arith.constant 0 : i32
    return %arg0, %c0_i32 : i32, i32
  }
}

</mosaic_0001>

<bundles_post_ra>
// kernel: tpu_custom_call.1
= control target key start
LH: loop header
LB: loop body
LE: loop exit
PB: predicated region body
PF: predicated region fallthrough
CT: control target
= control target key end

     0   :  { %16 = vsyncpa [#allocation3], 0  ;;  %s4561_s0 = inlined_call_operand.hbm [shape: f32[8,32], index: 0, kind: input, shape index: {}]   ;;  %s4562_s1 = inlined_call_operand.hbm [shape: bf16[32,128], index: 1, kind: input, shape index: {}]   ;;  %s4563_s2 = inlined_call_operand.hbm [shape: f32[1,128], index: 2, kind: input, shape index: {}]   ;;  %s4564_s3 = inlined_call_operand.hbm [shape: bf16[128,768], index: 3, kind: input, shape index: {}]   ;;  %s4565_s4 = inlined_call_operand.hbm [shape: f32[1,768], index: 4, kind: input, shape index: {}]   ;;  %s4566_s5 = inlined_call_operand.hbm [shape: bf16[768,384], index: 5, kind: input, shape index: {}]   ;;  %s4567_s6 = inlined_call_operand.vmem [shape: f32[1,384], index: 6, kind: input, shape index: {}]   ;;  %s4568_s7 = inlined_call_operand.hbm [shape: bf16[384,384], index: 7, kind: input, shape index: {}]   ;;  %s4569_s8 = inlined_call_operand.vmem [shape: f32[1,384], index: 8, kind: input, shape index: {}]   ;;  %s4570_s9 = inlined_call_operand.hbm [shape: bf16[384,128], index: 9, kind: input, shape index: {}]   ;;  %s4571_s10 = inlined_call_operand.vmem [shape: f32[1,128], index: 10, kind: input, shape index: {}]   ;;  %s4572_s11 = inlined_call_operand.hbm [shape: f32[8,128], index: 11, kind: output, shape index: {}]  }
   0x1   :  { %17 = vsyncpa [#allocation6], 0 }
   0x2   :  { %18 = vsyncpa [#allocation9], 0 }
   0x3   :  { %19 = vsyncpa [#allocation12], 0 }
   0x4   :  { %20 = vsyncpa [#allocation15], 0  ;;  %s37_s19 = sshll.u32 %s4562_s1, 4  ;;  %s38_s19 = int_to_ptr.hbm [resolvable:$true] %s37_s19 }
   0x5   :  { %21 = vsyncpa [#allocation4], 0  ;;  %s4381_s20 = smov [#allocation5]   ;;  %s61_s24 = sshll.u32 %s4564_s3, 4  ;;  %s62_s24 = int_to_ptr.hbm [resolvable:$true] %s61_s24 }
   0x6   :  { %s39_s21 = sshll.u32 %s4381_s20, 4  ;;  %s4382_s25 = smov 64   ;;  %s40_s21 = int_to_ptr.vmem [resolvable:$true] %s39_s21 }
   0x7   :  { %s4383_s26 = smov 4   ;;  %s4384_s27 = smov [#allocation8]  }
   0x8   :  { %45 = dma.hbm_to_vmem [thread:$0]  %s38_s19, 256, %s40_s21, [#allocation6], %s4382_s25, %s4382_s25, %s4383_s26  }
   0x9   :  { %s63_s28 = sshll.u32 %s4384_s27, 4  ;;  %s4385_s1 = smov 384   ;;  %s64_s28 = int_to_ptr.vmem [resolvable:$true] %s63_s28 }
   0xa   :  { %s4386_s29 = smov 24   ;;  %s85_s13 = sshll.u32 %s4566_s5, 4  ;;  %s86_s13 = int_to_ptr.hbm [resolvable:$true] %s85_s13 }
   0xb   :  { %69 = dma.hbm_to_vmem [thread:$0]  %s62_s24, 6144, %s64_s28, [#allocation9], %s4385_s1, %s4385_s1, %s4386_s29  }
   0xc   :  { %s4387_s14 = smov [#allocation11]   ;;  %s27_s17 = sshll.u32 %s4561_s0, 4  ;;  %s28_s17 = int_to_ptr.hbm [resolvable:$true] %s27_s17 }
   0xd   :  { %s87_s3 = sshll.u32 %s4387_s14, 4  ;;  %s4388_s18 = smov 192   ;;  %s88_s3 = int_to_ptr.vmem [resolvable:$true] %s87_s3 }
   0xe   :  { %s4389_s19 = smov 12   ;;  %s4390_s20 = smov [#allocation2]  }
   0xf   :  { %93 = dma.hbm_to_vmem [thread:$0]  %s86_s13, 18432, %s88_s3, [#allocation12], %s4388_s18, %s4388_s18, %s4389_s19  }
  0x10   :  { %s29_s21 = sshll.u32 %s4390_s20, 4  ;;  %s51_s5 = sshll.u32 %s4563_s2, 4  ;;  %s30_s21 = int_to_ptr.vmem [resolvable:$true] %s29_s21  ;;  %s52_s5 = int_to_ptr.hbm [resolvable:$true] %s51_s5 }
  0x11   :  { %32 = dma.hbm_to_vmem [thread:$0]  %s28_s17, 128, %s30_s21, [#allocation3]  }
  0x12   :  { %s75_s0 = sshll.u32 %s4565_s4, 4  ;;  %s4391_s28 = smov [#allocation7]   ;;  %s76_s0 = int_to_ptr.hbm [resolvable:$true] %s75_s0 }
  0x13   :  { %s53_s1 = sshll.u32 %s4391_s28, 4  ;;  %s4392_s29 = smov [#allocation10]   ;;  %s54_s1 = int_to_ptr.vmem [resolvable:$true] %s53_s1 }
  0x14   :  { %56 = dma.hbm_to_vmem [thread:$0]  %s52_s5, 16, %s54_s1, [#allocation6]  }
  0x15   :  { %s77_s30 = sshll.u32 %s4392_s29, 4  ;;  %s100_s14 = sshll.u32 %s4568_s7, 4  ;;  %s78_s30 = int_to_ptr.vmem [resolvable:$true] %s77_s30  ;;  %s101_s14 = int_to_ptr.hbm [resolvable:$true] %s100_s14 }
  0x16   :  { %80 = dma.hbm_to_vmem [thread:$0]  %s76_s0, 96, %s78_s30, [#allocation9]  }
  0x17   :  { %s115_s15 = sshll.u32 %s4570_s9, 4  ;;  %s4393_s16 = smov [#allocation13]   ;;  %s116_s15 = int_to_ptr.hbm [resolvable:$true] %s115_s15 }
  0x18   :  { %s102_s4 = sshll.u32 %s4393_s16, 4  ;;  %s4394_s17 = smov [#allocation14]   ;;  %s103_s4 = int_to_ptr.vmem [resolvable:$true] %s102_s4 }
  0x19   :  { %108 = dma.hbm_to_vmem [thread:$0]  %s101_s14, 9216, %s103_s4, [#allocation12], %s4388_s18, %s4388_s18, %s4389_s19  }
  0x1a   :  { %s117_s20 = sshll.u32 %s4394_s17, 4  ;;  %s118_s20 = int_to_ptr.vmem [resolvable:$true] %s117_s20 }
  0x1b   :  { %123 = dma.hbm_to_vmem [thread:$0]  %s116_s15, 3072, %s118_s20, [#allocation15], %s4382_s25, %s4382_s25, %s4383_s26  }
  0x1c   :  { %4369 = dma.done.wait [#allocation3], 128  }
  0x1d   :  { %4370 = vsyncadd [#allocation3], 4294967168 }
  0x1e   :  { %4371 = dma.done.wait [#allocation6], 272  }
  0x1f   :  { %4372 = vsyncadd [#allocation6], 4294967024 }
  0x20   :  { %4373 = dma.done.wait [#allocation9], 6240  }
  0x21   :  { %4374 = vsyncadd [#allocation9], 4294961056 }
  0x22   :  { %4375 = dma.done.wait [#allocation12], 27648  }
  0x23   :  { %4376 = vsyncadd [#allocation12], 4294939648 }
  0x24   :  { %4377 = dma.done.wait [#allocation15], 3072  }
  0x25   :  { %4378 = vsyncadd [#allocation15], 4294964224  ;;  %v3843_v0 = vld [vmem:[#allocation5 + $0x8] sm:$0xff]  ;;  %v3842_v1 = vld [vmem:[#allocation5] sm:$0xff]  ;;  %vm181_vm0 = vcmask 261120   ;;  %s4395_s18 = smov [#allocation16]  }
  0x26   :  { %v159_v2 = vld [vmem:[#allocation2] sm:$0xff]  ;;  %v2860_v3 = vld [vmem:[#allocation8 + $0x150] sm:$0xf]  ;;  %v3886_v5 = vld [vmem:[#allocation8 + $0x154] sm:$0xf]  ;;  %191 = vmatpush.bf16.msra.mxu0 %v3843_v0  ;;  %s2665_s19 = sshll.u32 %s4395_s18, 4  ;;  %s2666_s19 = int_to_ptr.vmem [resolvable:$true] %s2665_s19 }
  0x27   :  { %v3889_v4 = vld [vmem:[#allocation8 + $0x164] sm:$0xf0]  ;;  %v2862_v7 = vld [vmem:[#allocation8 + $0x168] sm:$0xf0]  ;;  %v2836_v8 = vld [vmem:[#allocation8 + $0x120] sm:$0xf]  ;;  %v160_v14 = vpack.c.bf16 %v159_v2, %v159_v2 }
  0x28   :  { %v2861_v6 = vor.u32 %v3889_v4, %v2860_v3  ;;  %v3883_v9 = vld [vmem:[#allocation8 + $0x134] sm:$0xf0]  ;;  %v2865_v10 = vor.u32 %v3886_v5, %v2862_v7  ;;  %v3880_v11 = vld [vmem:[#allocation8 + $0x124] sm:$0xf]  ;;  %v2838_v12 = vld [vmem:[#allocation8 + $0x138] sm:$0xf0] }
  0x29   :  { %v2837_v13 = vor.u32 %v3883_v9, %v2836_v8  ;;  %v2841_v15 = vor.u32 %v3880_v11, %v2838_v12  ;;  %v2812_v16 = vld [vmem:[#allocation8 + $0xf0] sm:$0xf]  ;;  %v3877_v17 = vld [vmem:[#allocation8 + $0x104] sm:$0xf0]  ;;  %v3874_v18 = vld [vmem:[#allocation8 + $0xf4] sm:$0xf] }
  0x2a   :  { %502 = vmatpush.bf16.msra.mxu1 %v2861_v6  ;;  %515 = vmatpush.bf16.msra.mxu2 %v2865_v10  ;;  %v2814_v19 = vld [vmem:[#allocation8 + $0x108] sm:$0xf0]  ;;  %v2868_v20 = vld [vmem:[#allocation8 + $0x158] sm:$0xf]  ;;  %v3890_v21 = vld [vmem:[#allocation8 + $0x16c] sm:$0xf0]  ;;  %v2813_v25 = vor.u32 %v3877_v17, %v2812_v16 }
  0x2b   :  { %192 = vmatpush.bf16.msra.mxu0 %v3842_v1  ;;  %v2869_v22 = vor.u32 %v3890_v21, %v2868_v20  ;;  %v3887_v23 = vld [vmem:[#allocation8 + $0x15c] sm:$0xf]  ;;  %v2870_v24 = vld [vmem:[#allocation8 + $0x170] sm:$0xf0]  ;;  %v2788_v26 = vld [vmem:[#allocation8 + $0xc0] sm:$0xf]  ;;  %v2817_v29 = vor.u32 %v3874_v18, %v2814_v19 }
  0x2c   :  { %v3871_v27 = vld [vmem:[#allocation8 + $0xd4] sm:$0xf0]  ;;  %v2873_v28 = vor.u32 %v3887_v23, %v2870_v24  ;;  %v2844_v30 = vld [vmem:[#allocation8 + $0x128] sm:$0xf]  ;;  %v3884_v31 = vld [vmem:[#allocation8 + $0x13c] sm:$0xf0] }
  0x2d   :  { %v3881_v32 = vld [vmem:[#allocation8 + $0x12c] sm:$0xf]  ;;  %v3868_v33 = vld [vmem:[#allocation8 + $0xc4] sm:$0xf]  ;;  %v2790_v34 = vld [vmem:[#allocation8 + $0xd8] sm:$0xf0]  ;;  %528 = vmatpush.bf16.msra.mxu3 %v2869_v22  ;;  %v2845_v35 = vor.u32 %v3884_v31, %v2844_v30  ;;  %v2789_v39 = vor.u32 %v3871_v27, %v2788_v26 }
  0x2e   :  { %503 = vmatpush.bf16.msra.mxu1 %v2837_v13  ;;  %2689 = vmatmul.msk.bf16.vlgmr.msra.gmra.mxu0 %vm181_vm0, %v160_v14  ;;  %v2846_v36 = vld [vmem:[#allocation8 + $0x140] sm:$0xf0]  ;;  %v2820_v38 = vld [vmem:[#allocation8 + $0xf8] sm:$0xf]  ;;  %v3878_v40 = vld [vmem:[#allocation8 + $0x10c] sm:$0xf0]  ;;  %v2793_v43 = vor.u32 %v3868_v33, %v2790_v34 }
  0x2f   :  { %516 = vmatpush.bf16.msra.mxu2 %v2841_v15  ;;  %541 = vmatpush.bf16.msrb.mxu0 %v2873_v28  ;;  %v2849_v37 = vor.u32 %v3881_v32, %v2846_v36  ;;  %v3875_v41 = vld [vmem:[#allocation8 + $0xfc] sm:$0xf]  ;;  %v2822_v42 = vld [vmem:[#allocation8 + $0x110] sm:$0xf0]  ;;  %v2764_v44 = vld [vmem:[#allocation8 + $0x90] sm:$0xf]  ;;  %v2821_v48 = vor.u32 %v3878_v40, %v2820_v38 }
  0x30   :  { %v3865_v45 = vld [vmem:[#allocation8 + $0xa4] sm:$0xf0]  ;;  %v3862_v46 = vld [vmem:[#allocation8 + $0x94] sm:$0xf]  ;;  %v2766_v47 = vld [vmem:[#allocation8 + $0xa8] sm:$0xf0]  ;;  %v2825_v49 = vor.u32 %v3875_v41, %v2822_v42 }
  0x31   :  { %529 = vmatpush.bf16.msra.mxu3 %v2845_v35  ;;  %v2796_v50 = vld [vmem:[#allocation8 + $0xc8] sm:$0xf]  ;;  %v3872_v51 = vld [vmem:[#allocation8 + $0xdc] sm:$0xf0]  ;;  %v3869_v52 = vld [vmem:[#allocation8 + $0xcc] sm:$0xf]  ;;  %v2765_v54 = vor.u32 %v3865_v45, %v2764_v44  ;;  %v2769_v55 = vor.u32 %v3862_v46, %v2766_v47 }
  0x32   :  { %504 = vmatpush.bf16.msra.mxu1 %v2813_v25  ;;  %v2798_v53 = vld [vmem:[#allocation8 + $0xe0] sm:$0xf0]  ;;  %v2740_v56 = vld [vmem:[#allocation8 + $0x60] sm:$0xf]  ;;  %v3859_v57 = vld [vmem:[#allocation8 + $0x74] sm:$0xf0]  ;;  %v2797_v60 = vor.u32 %v3872_v51, %v2796_v50 }
  0x33   :  { %517 = vmatpush.bf16.msra.mxu2 %v2817_v29  ;;  %542 = vmatpush.bf16.msrb.mxu0 %v2849_v37  ;;  %v3856_v58 = vld [vmem:[#allocation8 + $0x64] sm:$0xf]  ;;  %v2742_v59 = vld [vmem:[#allocation8 + $0x78] sm:$0xf0]  ;;  %v2801_v61 = vor.u32 %v3869_v52, %v2798_v53  ;;  %v2772_v62 = vld [vmem:[#allocation8 + $0x98] sm:$0xf]  ;;  %v2741_v2 = vor.u32 %v3859_v57, %v2740_v56 }
  0x34   :  { %v3866_v63 = vld [vmem:[#allocation8 + $0xac] sm:$0xf0]  ;;  %v3863_v0 = vld [vmem:[#allocation8 + $0x9c] sm:$0xf]  ;;  %v2774_v1 = vld [vmem:[#allocation8 + $0xb0] sm:$0xf0]  ;;  %v2745_v4 = vor.u32 %v3856_v58, %v2742_v59 }
  0x35   :  { %530 = vmatpush.bf16.msra.mxu3 %v2821_v48  ;;  %v2716_v3 = vld [vmem:[#allocation8 + $0x30] sm:$0xf]  ;;  %v3853_v5 = vld [vmem:[#allocation8 + $0x44] sm:$0xf0]  ;;  %v3850_v6 = vld [vmem:[#allocation8 + $0x34] sm:$0xf]  ;;  %v2773_v8 = vor.u32 %v3866_v63, %v2772_v62  ;;  %v2777_v9 = vor.u32 %v3863_v0, %v2774_v1 }
  0x36   :  { %505 = vmatpush.bf16.msra.mxu1 %v2789_v39  ;;  %v2718_v7 = vld [vmem:[#allocation8 + $0x48] sm:$0xf0]  ;;  %v2748_v10 = vld [vmem:[#allocation8 + $0x68] sm:$0xf]  ;;  %v3860_v11 = vld [vmem:[#allocation8 + $0x7c] sm:$0xf0]  ;;  %v2717_v14 = vor.u32 %v3853_v5, %v2716_v3 }
  0x37   :  { %518 = vmatpush.bf16.msra.mxu2 %v2793_v43  ;;  %543 = vmatpush.bf16.msrb.mxu0 %v2825_v49  ;;  %v3857_v12 = vld [vmem:[#allocation8 + $0x6c] sm:$0xf]  ;;  %v2750_v13 = vld [vmem:[#allocation8 + $0x80] sm:$0xf0]  ;;  %v2721_v15 = vor.u32 %v3850_v6, %v2718_v7  ;;  %v2692_v16 = vld [vmem:[#allocation8] sm:$0xf]  ;;  %v2749_v22 = vor.u32 %v3860_v11, %v2748_v10 }
  0x38   :  { %v3847_v17 = vld [vmem:[#allocation8 + $0x14] sm:$0xf0]  ;;  %v3844_v18 = vld [vmem:[#allocation8 + $0x4] sm:$0xf]  ;;  %v2694_v19 = vld [vmem:[#allocation8 + $0x18] sm:$0xf0]  ;;  %v2753_v23 = vor.u32 %v3857_v12, %v2750_v13 }
  0x39   :  { %531 = vmatpush.bf16.msra.mxu3 %v2797_v60  ;;  %v2876_v20 = vld [vmem:[#allocation8 + $0x160] sm:$0xf]  ;;  %v3891_v21 = vld [vmem:[#allocation8 + $0x174] sm:$0xf0]  ;;  %v3888_v24 = vld [vmem:[#allocation8 + $0x164] sm:$0xf]  ;;  %v2693_v26 = vor.u32 %v3847_v17, %v2692_v16  ;;  %v2697_v27 = vor.u32 %v3844_v18, %v2694_v19 }
  0x3a   :  { %506 = vmatpush.bf16.msra.mxu1 %v2765_v54  ;;  %v2878_v25 = vld [vmem:[#allocation8 + $0x178] sm:$0xf0]  ;;  %v2877_v28 = vor.u32 %v3891_v21, %v2876_v20  ;;  %v2852_v30 = vld [vmem:[#allocation8 + $0x130] sm:$0xf]  ;;  %v3885_v31 = vld [vmem:[#allocation8 + $0x144] sm:$0xf0] }
  0x3b   :  { %519 = vmatpush.bf16.msra.mxu2 %v2769_v55  ;;  %544 = vmatpush.bf16.msrb.mxu0 %v2801_v61  ;;  %v2881_v29 = vor.u32 %v3888_v24, %v2878_v25  ;;  %v3882_v32 = vld [vmem:[#allocation8 + $0x134] sm:$0xf]  ;;  %v2854_v33 = vld [vmem:[#allocation8 + $0x148] sm:$0xf0]  ;;  %v2853_v34 = vor.u32 %v3885_v31, %v2852_v30  ;;  %v2724_v36 = vld [vmem:[#allocation8 + $0x38] sm:$0xf] }
  0x3c   :  { %v2857_v35 = vor.u32 %v3882_v32, %v2854_v33  ;;  %v3854_v37 = vld [vmem:[#allocation8 + $0x4c] sm:$0xf0]  ;;  %v3851_v38 = vld [vmem:[#allocation8 + $0x3c] sm:$0xf]  ;;  %v2726_v40 = vld [vmem:[#allocation8 + $0x50] sm:$0xf0] }
  0x3d   :  { %532 = vmatpush.bf16.msra.mxu3 %v2773_v8  ;;  %v2725_v39 = vor.u32 %v3854_v37, %v2724_v36  ;;  %v2828_v41 = vld [vmem:[#allocation8 + $0x100] sm:$0xf]  ;;  %v3879_v42 = vld [vmem:[#allocation8 + $0x114] sm:$0xf0]  ;;  %v2729_v43 = vor.u32 %v3851_v38, %v2726_v40  ;;  %v3876_v45 = vld [vmem:[#allocation8 + $0x104] sm:$0xf] }
  0x3e   :  { %507 = vmatpush.bf16.msra.mxu1 %v2741_v2  ;;  %v2829_v44 = vor.u32 %v3879_v42, %v2828_v41  ;;  %v2830_v46 = vld [vmem:[#allocation8 + $0x118] sm:$0xf0]  ;;  %v2700_v48 = vld [vmem:[#allocation8 + $0x8] sm:$0xf]  ;;  %v3848_v49 = vld [vmem:[#allocation8 + $0x1c] sm:$0xf0] }
  0x3f   :  { %520 = vmatpush.bf16.msra.mxu2 %v2745_v4  ;;  %545 = vmatpush.bf16.msrb.mxu0 %v2777_v9  ;;  %v2833_v47 = vor.u32 %v3876_v45, %v2830_v46  ;;  %v3845_v50 = vld [vmem:[#allocation8 + $0xc] sm:$0xf]  ;;  %v2701_v51 = vor.u32 %v3848_v49, %v2700_v48  ;;  %v2702_v52 = vld [vmem:[#allocation8 + $0x20] sm:$0xf0]  ;;  %v2804_v53 = vld [vmem:[#allocation8 + $0xd0] sm:$0xf] }
  0x40   :  { %v3873_v54 = vld [vmem:[#allocation8 + $0xe4] sm:$0xf0]  ;;  %v2705_v55 = vor.u32 %v3845_v50, %v2702_v52  ;;  %v3870_v57 = vld [vmem:[#allocation8 + $0xd4] sm:$0xf]  ;;  %v2806_v58 = vld [vmem:[#allocation8 + $0xe8] sm:$0xf0] }
  0x41   :  { %533 = vmatpush.bf16.msra.mxu3 %v2749_v22  ;;  %v2805_v56 = vor.u32 %v3873_v54, %v2804_v53  ;;  %v2809_v59 = vor.u32 %v3870_v57, %v2806_v58  ;;  %v2780_v60 = vld [vmem:[#allocation8 + $0xa0] sm:$0xf]  ;;  %v3867_v61 = vld [vmem:[#allocation8 + $0xb4] sm:$0xf0]  ;;  %v3864_v62 = vld [vmem:[#allocation8 + $0xa4] sm:$0xf] }
  0x42   :  { %508 = vmatpush.bf16.msra.mxu1 %v2717_v14  ;;  %v2781_v63 = vor.u32 %v3867_v61, %v2780_v60  ;;  %v2782_v0 = vld [vmem:[#allocation8 + $0xb8] sm:$0xf0]  ;;  %v2756_v2 = vld [vmem:[#allocation8 + $0x70] sm:$0xf]  ;;  %v3861_v3 = vld [vmem:[#allocation8 + $0x84] sm:$0xf0] }
  0x43   :  { %521 = vmatpush.bf16.msra.mxu2 %v2721_v15  ;;  %546 = vmatpush.bf16.msrb.mxu0 %v2753_v23  ;;  %v2785_v1 = vor.u32 %v3864_v62, %v2782_v0  ;;  %v3858_v4 = vld [vmem:[#allocation8 + $0x74] sm:$0xf]  ;;  %v2757_v5 = vor.u32 %v3861_v3, %v2756_v2  ;;  %v2758_v6 = vld [vmem:[#allocation8 + $0x88] sm:$0xf0]  ;;  %v2732_v8 = vld [vmem:[#allocation8 + $0x40] sm:$0xf] }
  0x44   :  { %v2761_v7 = vor.u32 %v3858_v4, %v2758_v6  ;;  %v3855_v9 = vld [vmem:[#allocation8 + $0x54] sm:$0xf0]  ;;  %v3852_v10 = vld [vmem:[#allocation8 + $0x44] sm:$0xf]  ;;  %v2734_v11 = vld [vmem:[#allocation8 + $0x58] sm:$0xf0] }
  0x45   :  { %534 = vmatpush.bf16.msra.mxu3 %v2725_v39  ;;  %v2733_v12 = vor.u32 %v3855_v9, %v2732_v8  ;;  %v2737_v13 = vor.u32 %v3852_v10, %v2734_v11  ;;  %v2708_v14 = vld [vmem:[#allocation8 + $0x10] sm:$0xf]  ;;  %v3849_v15 = vld [vmem:[#allocation8 + $0x24] sm:$0xf0]  ;;  %v3846_v16 = vld [vmem:[#allocation8 + $0x14] sm:$0xf] }
  0x46   :  { %509 = vmatpush.bf16.msra.mxu1 %v2693_v26  ;;  %v2710_v17 = vld [vmem:[#allocation8 + $0x28] sm:$0xf0]  ;;  %v2709_v18 = vor.u32 %v3849_v15, %v2708_v14  ;;  %v3914_v21 = vld [vmem:[#allocation11 + $0xb0] sm:$0xf0]  ;;  %v2956_v23 = vld [vmem:[#allocation11 + $0x90] sm:$0xf] }
  0x47   :  { %522 = vmatpush.bf16.msra.mxu2 %v2697_v27  ;;  %547 = vmatpush.bf16.msrb.mxu0 %v2729_v43  ;;  %v2713_v19 = vor.u32 %v3846_v16, %v2710_v17  ;;  %v2968_v20 = vld [vmem:[#allocation11 + $0xa8] sm:$0xf]  ;;  %v3911_v24 = vld [vmem:[#allocation11 + $0x98] sm:$0xf0]  ;;  %v3938_v27 = vld [vmem:[#allocation11 + $0x170] sm:$0xf0] }
  0x48   :  { %v2969_v22 = vor.u32 %v3914_v21, %v2968_v20  ;;  %v3064_v25 = vld [vmem:[#allocation11 + $0x168] sm:$0xf]  ;;  %v2957_v26 = vor.u32 %v3911_v24, %v2956_v23  ;;  %v3908_v30 = vld [vmem:[#allocation11 + $0x80] sm:$0xf0]  ;;  %v3052_v31 = vld [vmem:[#allocation11 + $0x150] sm:$0xf] }
  0x49   :  { %535 = vmatpush.bf16.msra.mxu3 %v2701_v51  ;;  %v3935_v32 = vld [vmem:[#allocation11 + $0x158] sm:$0xf0]  ;;  %v4147_v33 = vld [vmem:[#allocation7] ss:$0 sm:$0xff]  ;;  %v2932_v36 = vld [vmem:[#allocation11 + $0x60] sm:$0xf] }
  0x4a   :  { %554 = vmatpush.bf16.msrb.mxu1 %v2877_v28  ;;  %v3065_v28 = vor.u32 %v3938_v27, %v3064_v25  ;;  %v3905_v37 = vld [vmem:[#allocation11 + $0x68] sm:$0xf0]  ;;  %v3040_v38 = vld [vmem:[#allocation11 + $0x138] sm:$0xf]  ;;  %v3932_v39 = vld [vmem:[#allocation11 + $0x140] sm:$0xf0] }
  0x4b   :  { %567 = vmatpush.bf16.msrb.mxu2 %v2881_v29  ;;  %548 = vmatpush.bf16.msrb.mxu0 %v2705_v55  ;;  %v2944_v29 = vld [vmem:[#allocation11 + $0x78] sm:$0xf]  ;;  %v3256_v42 = vld [vmem:[#allocation11 + $0x2e8] sm:$0xf]  ;;  %v3986_v43 = vld [vmem:[#allocation11 + $0x2f0] sm:$0xf0]  ;;  %v3041_v45 = vor.u32 %v3932_v39, %v3040_v38 }
  0x4c   :  { %v3962_v46 = vld [vmem:[#allocation11 + $0x230] sm:$0xf0]  ;;  %v2920_v48 = vld [vmem:[#allocation11 + $0x48] sm:$0xf]  ;;  %v3028_v51 = vld [vmem:[#allocation11 + $0x120] sm:$0xf]  ;;  %v3257_v54 = vor.u32 %v3986_v43, %v3256_v42 }
  0x4d   :  { %1560 = vmatpush.bf16.msrb.mxu3 %v2969_v22  ;;  %v3902_v49 = vld [vmem:[#allocation11 + $0x50] sm:$0xf0]  ;;  %v3929_v52 = vld [vmem:[#allocation11 + $0x128] sm:$0xf0]  ;;  %v3244_v55 = vld [vmem:[#allocation11 + $0x2d0] sm:$0xf] }
  0x4e   :  { %555 = vmatpush.bf16.msrb.mxu1 %v2853_v34  ;;  %v3053_v34 = vor.u32 %v3935_v32, %v3052_v31  ;;  %v3148_v58 = vld [vmem:[#allocation11 + $0x210] sm:$0xf]  ;;  %v2921_v60 = vor.u32 %v3902_v49, %v2920_v48  ;;  %v3029_v61 = vor.u32 %v3929_v52, %v3028_v51  ;;  %v3016_v0 = vld [vmem:[#allocation11 + $0x108] sm:$0xf]  ;;  %v3232_v4 = vld [vmem:[#allocation11 + $0x2b8] sm:$0xf] }
  0x4f   :  { %568 = vmatpush.bf16.msrb.mxu2 %v2857_v35  ;;  %1573 = vmatpush.bf16.msra.mxu0 %v3065_v28  ;;  %v2945_v35 = vor.u32 %v3908_v30, %v2944_v29  ;;  %v2908_v62 = vld [vmem:[#allocation11 + $0x30] sm:$0xf]  ;;  %v3956_v8 = vld [vmem:[#allocation11 + $0x200] sm:$0xf0]  ;;  %v2896_v11 = vld [vmem:[#allocation11 + $0x18] sm:$0xf] }
  0x50   :  { %v3923_v14 = vld [vmem:[#allocation11 + $0xf8] sm:$0xf0]  ;;  %v3220_v16 = vld [vmem:[#allocation11 + $0x2a0] sm:$0xf]  ;;  %v3977_v17 = vld [vmem:[#allocation11 + $0x2a8] sm:$0xf0] }
  0x51   :  { %1561 = vmatpush.bf16.msrb.mxu3 %v2957_v26  ;;  %v3953_v20 = vld [vmem:[#allocation11 + $0x1e8] sm:$0xf0]  ;;  %v2884_v23 = vld [vmem:[#allocation11] sm:$0xf]  ;;  %v2992_v25 = vld [vmem:[#allocation11 + $0xd8] sm:$0xf]  ;;  %v3221_v27 = vor.u32 %v3977_v17, %v3220_v16 }
  0x52   :  { %556 = vmatpush.bf16.msrb.mxu1 %v2829_v44  ;;  %v3160_v44 = vld [vmem:[#allocation11 + $0x228] sm:$0xf]  ;;  %v3893_v24 = vld [vmem:[#allocation11 + $0x8] sm:$0xf0]  ;;  %v3920_v26 = vld [vmem:[#allocation11 + $0xe0] sm:$0xf0] }
  0x53   :  { %569 = vmatpush.bf16.msrb.mxu2 %v2833_v47  ;;  %1574 = vmatpush.bf16.msra.mxu0 %v3053_v34  ;;  %v2933_v47 = vor.u32 %v3905_v37, %v2932_v36  ;;  %v3161_v57 = vor.u32 %v3962_v46, %v3160_v44  ;;  %v3208_v28 = vld [vmem:[#allocation11 + $0x288] sm:$0xf]  ;;  %v4010_v31 = vld [vmem:[#allocation11 + $0x3b0] sm:$0xf0]  ;;  %v2993_v36 = vor.u32 %v3920_v26, %v2992_v25  ;;  %v2980_v37 = vld [vmem:[#allocation11 + $0xc0] sm:$0xf] }
  0x54   :  { %v3352_v30 = vld [vmem:[#allocation11 + $0x3a8] sm:$0xf]  ;;  %v3974_v32 = vld [vmem:[#allocation11 + $0x290] sm:$0xf0]  ;;  %v3917_v38 = vld [vmem:[#allocation11 + $0xc8] sm:$0xf0] }
  0x55   :  { %1562 = vmatpush.bf16.msrb.mxu3 %v2945_v35  ;;  %v3950_v34 = vld [vmem:[#allocation11 + $0x1d0] sm:$0xf0]  ;;  %v2885_v35 = vor.u32 %v3893_v24, %v2884_v23  ;;  %v3353_v39 = vor.u32 %v4010_v31, %v3352_v30  ;;  %v3209_v42 = vor.u32 %v3974_v32, %v3208_v28  ;;  %v3196_v43 = vld [vmem:[#allocation11 + $0x270] sm:$0xf]  ;;  %v4007_v46 = vld [vmem:[#allocation11 + $0x398] sm:$0xf0] }
  0x56   :  { %557 = vmatpush.bf16.msrb.mxu1 %v2805_v56  ;;  %v3983_v56 = vld [vmem:[#allocation11 + $0x2d8] sm:$0xf0]  ;;  %v3100_v48 = vld [vmem:[#allocation11 + $0x1b0] sm:$0xf]  ;;  %v3412_v17 = vld [vmem:[#allocation11 + $0x420] sm:$0xf] }
  0x57   :  { %570 = vmatpush.bf16.msrb.mxu2 %v2809_v59  ;;  %1575 = vmatpush.bf16.msra.mxu0 %v3041_v45  ;;  %v3959_v59 = vld [vmem:[#allocation11 + $0x218] sm:$0xf0]  ;;  %v3245_v3 = vor.u32 %v3983_v56, %v3244_v55  ;;  %v3340_v45 = vld [vmem:[#allocation11 + $0x390] sm:$0xf]  ;;  %v3934_v24 = vld [vmem:[#allocation11 + $0x154] sm:$0xf] }
  0x58   :  { %v3149_v6 = vor.u32 %v3959_v59, %v3148_v58  ;;  %v3947_v49 = vld [vmem:[#allocation11 + $0x1b8] sm:$0xf0]  ;;  %v3341_v52 = vor.u32 %v4007_v46, %v3340_v45  ;;  %v3328_v59 = vld [vmem:[#allocation11 + $0x378] sm:$0xf]  ;;  %v3054_v26 = vld [vmem:[#allocation11 + $0x15c] sm:$0xf0] }
  0x59   :  { %1563 = vmatpush.bf16.msrb.mxu3 %v2933_v47  ;;  %v3971_v47 = vld [vmem:[#allocation11 + $0x278] sm:$0xf0]  ;;  %v3101_v58 = vor.u32 %v3947_v49, %v3100_v48  ;;  %v2958_v28 = vld [vmem:[#allocation11 + $0x9c] sm:$0xf0]  ;;  %v3292_v31 = vld [vmem:[#allocation11 + $0x330] sm:$0xf] }
  0x5a   :  { %558 = vmatpush.bf16.msrb.mxu1 %v2781_v63  ;;  %v3899_v63 = vld [vmem:[#allocation11 + $0x38] sm:$0xf0]  ;;  %v3197_v56 = vor.u32 %v3971_v47, %v3196_v43  ;;  %v3030_v43 = vld [vmem:[#allocation11 + $0x12c] sm:$0xf0]  ;;  %v3925_v48 = vld [vmem:[#allocation11 + $0x10c] sm:$0xf] }
  0x5b   :  { %571 = vmatpush.bf16.msrb.mxu2 %v2785_v1  ;;  %v3926_v1 = vld [vmem:[#allocation11 + $0x110] sm:$0xf0]  ;;  %1576 = vmatpush.bf16.msra.mxu0 %v3029_v61  ;;  %v2909_v9 = vor.u32 %v3899_v63, %v2908_v62  ;;  %v4031_v55 = vld [vmem:[#allocation11 + $0x458] sm:$0xf0]  ;;  %v3968_v61 = vld [vmem:[#allocation11 + $0x260] sm:$0xf0] }
  0x5c   :  { %v3017_v10 = vor.u32 %v3926_v1, %v3016_v0  ;;  %v3088_v62 = vld [vmem:[#allocation11 + $0x198] sm:$0xf]  ;;  %v3944_v63 = vld [vmem:[#allocation11 + $0x1a0] sm:$0xf0]  ;;  %v3172_v1 = vld [vmem:[#allocation11 + $0x240] sm:$0xf] }
  0x5d   :  { %1564 = vmatpush.bf16.msrb.mxu3 %v2921_v60  ;;  %v4004_v60 = vld [vmem:[#allocation11 + $0x380] sm:$0xf0]  ;;  %v3995_v32 = vld [vmem:[#allocation11 + $0x338] sm:$0xf0]  ;;  %v2934_v45 = vld [vmem:[#allocation11 + $0x6c] sm:$0xf0] }
  0x5e   :  { %559 = vmatpush.bf16.msrb.mxu1 %v2757_v5  ;;  %v3980_v5 = vld [vmem:[#allocation11 + $0x2c0] sm:$0xf0]  ;;  %v3018_v49 = vld [vmem:[#allocation11 + $0x114] sm:$0xf0]  ;;  %s2667_s22 = sshll.u32 %s4572_s11, 4  ;;  %s2668_s22 = int_to_ptr.hbm [resolvable:$true] %s2667_s22 }
  0x5f   :  { %572 = vmatpush.bf16.msrb.mxu2 %v2761_v7  ;;  %v3136_v7 = vld [vmem:[#allocation11 + $0x1f8] sm:$0xf]  ;;  %v3233_v15 = vor.u32 %v3980_v5, %v3232_v4  ;;  %1577 = vmatpush.bf16.msra.mxu0 %v3017_v10  ;;  %v3965_v5 = vld [vmem:[#allocation11 + $0x248] sm:$0xf0]  ;;  %v3076_v10 = vld [vmem:[#allocation11 + $0x180] sm:$0xf] }
  0x61   :  { %1565 = vmatpush.bf16.msrb.mxu3 %v2909_v9  ;;  %v3937_v9 = vld [vmem:[#allocation11 + $0x16c] sm:$0xf] }
  0x62   :  { %560 = vmatpush.bf16.msrb.mxu1 %v2733_v12  ;;  %v3896_v12 = vld [vmem:[#allocation11 + $0x20] sm:$0xf0] }
  0x63   :  { %573 = vmatpush.bf16.msrb.mxu2 %v2737_v13  ;;  %v3004_v13 = vld [vmem:[#allocation11 + $0xf0] sm:$0xf]  ;;  %v2897_v21 = vor.u32 %v3896_v12, %v2896_v11  ;;  %v3941_v11 = vld [vmem:[#allocation11 + $0x188] sm:$0xf0]  ;;  %v3066_v12 = vld [vmem:[#allocation11 + $0x174] sm:$0xf0] }
  0x64   :  { %v3005_v22 = vor.u32 %v3923_v14, %v3004_v13  ;;  %v3913_v13 = vld [vmem:[#allocation11 + $0xac] sm:$0xf]  ;;  %v2970_v14 = vld [vmem:[#allocation11 + $0xb4] sm:$0xf0]  ;;  %v3069_v23 = vor.u32 %v3937_v9, %v3066_v12  ;;  %v2982_v12 = vld [vmem:[#allocation11 + $0xcc] sm:$0xf0] }
  0x65   :  { %1566 = vmatpush.bf16.msrb.mxu3 %v2897_v21  ;;  %v3304_v21 = vld [vmem:[#allocation11 + $0x348] sm:$0xf]  ;;  %v2973_v25 = vor.u32 %v3913_v13, %v2970_v14  ;;  %v3989_v9 = vld [vmem:[#allocation11 + $0x308] sm:$0xf0]  ;;  %v3376_v14 = vld [vmem:[#allocation11 + $0x3d8] sm:$0xf] }
  0x66   :  { %561 = vmatpush.bf16.msrb.mxu1 %v2709_v18  ;;  %v3137_v18 = vor.u32 %v3956_v8, %v3136_v7  ;;  %1578 = vmatpush.bf16.msra.mxu0 %v3005_v22  ;;  %v3316_v7 = vld [vmem:[#allocation11 + $0x360] sm:$0xf]  ;;  %v4001_v8 = vld [vmem:[#allocation11 + $0x368] sm:$0xf0]  ;;  %v3998_v22 = vld [vmem:[#allocation11 + $0x350] sm:$0xf0] }
  0x67   :  { %574 = vmatpush.bf16.msrb.mxu2 %v2713_v19  ;;  %v3124_v19 = vld [vmem:[#allocation11 + $0x1e0] sm:$0xf]  ;;  %v3317_v16 = vor.u32 %v4001_v8, %v3316_v7  ;;  %v3305_v30 = vor.u32 %v3998_v22, %v3304_v21  ;;  %v4013_v21 = vld [vmem:[#allocation11 + $0x3c8] sm:$0xf0] }
  0x68   :  { %v3125_v29 = vor.u32 %v3953_v20, %v3124_v19  ;;  %v3173_v19 = vor.u32 %v3965_v5, %v3172_v1  ;;  %v3077_v20 = vor.u32 %v3941_v11, %v3076_v10  ;;  %v2994_v1 = vld [vmem:[#allocation11 + $0xe4] sm:$0xf0]  ;;  %v3268_v8 = vld [vmem:[#allocation11 + $0x300] sm:$0xf]  ;;  %v3916_v10 = vld [vmem:[#allocation11 + $0xc4] sm:$0xf] }
  0x69   :  { %1567 = vmatpush.bf16.msrb.mxu3 %v2885_v35  ;;  %v3269_v11 = vor.u32 %v3989_v9, %v3268_v8  ;;  %v2985_v13 = vor.u32 %v3916_v10, %v2982_v12  ;;  %v4006_v10 = vld [vmem:[#allocation11 + $0x394] sm:$0xf] }
  0x6a   :  { %1579 = vmatpush.bf16.msra.mxu0 %v2993_v36  ;;  %v3042_v36 = vld [vmem:[#allocation11 + $0x144] sm:$0xf0] }
  0xab   :  { %v194_v40 = vpop.f32.mrf.mxu0 }
  0xac   :  { %v195_v41 = vadd.f32 %v4147_v33, %v194_v40  ;;  %v3112_v33 = vld [vmem:[#allocation11 + $0x1c8] sm:$0xf] }
  0xad   :  { %v3448_v40 = vld [vmem:[#allocation11 + $0x468] sm:$0xf]  ;;  %v3113_v44 = vor.u32 %v3950_v34, %v3112_v33  ;;  %v3057_v33 = vor.u32 %v3934_v24, %v3054_v26  ;;  %v3931_v34 = vld [vmem:[#allocation11 + $0x13c] sm:$0xf]  ;;  %v2886_v24 = vld [vmem:[#allocation11 + $0xc] sm:$0xf0] }
  0xae   :  { %v198_v50 = vmax.f32 %v195_v41, 0.0  ;;  %v4034_v41 = vld [vmem:[#allocation11 + $0x470] sm:$0xf0]  ;;  %v4501_v26 = vld [vmem:[#allocation10] sm:$0x3f] }
  0xaf   :  { %v3449_v51 = vor.u32 %v4034_v41, %v3448_v40  ;;  %v3045_v40 = vor.u32 %v3931_v34, %v3042_v36  ;;  %v3928_v41 = vld [vmem:[#allocation11 + $0x124] sm:$0xf]  ;;  %v3450_v36 = vld [vmem:[#allocation11 + $0x474] sm:$0xf0] }
  0xb0   :  { %v4493_v53 = vpack.c.bf16 %v198_v50, %v198_v50  ;;  %v2981_v50 = vor.u32 %v3917_v38, %v2980_v37  ;;  %v3907_v37 = vld [vmem:[#allocation11 + $0x7c] sm:$0xf]  ;;  %v2946_v38 = vld [vmem:[#allocation11 + $0x84] sm:$0xf0]  ;;  %v3033_v46 = vor.u32 %v3928_v41, %v3030_v43 }
  0xb2   :  { %510 = vmatmul.bf16.vlgmr.msra.gmra.mxu1 %v4493_v53  ;;  %523 = vmatmul.bf16.vlgmr.msra.gmra.mxu2 %v4493_v53 }
  0xb3   :  { %536 = vmatmul.bf16.vlgmr.msra.gmra.mxu3 %v4493_v53  ;;  %549 = vmatmul.bf16.vlgmr.msrb.gmra.mxu0 %v4493_v53  ;;  %v196_v2 = vpop.f32.mrf.mxu0 }
  0xb4   :  { %1599 = vmatpush.bf16.msra.mxu2 %v3257_v54  ;;  %1586 = vmatpush.bf16.msra.mxu1 %v3161_v57  ;;  %v3436_v54 = vld [vmem:[#allocation11 + $0x450] sm:$0xf]  ;;  %v3184_v57 = vld [vmem:[#allocation11 + $0x258] sm:$0xf] }
  0xb5   :  { %1612 = vmatpush.bf16.msra.mxu3 %v3353_v39  ;;  %1580 = vmatpush.bf16.msra.mxu0 %v2981_v50  ;;  %v3437_v0 = vor.u32 %v4031_v55, %v3436_v54  ;;  %v3424_v2 = vld [vmem:[#allocation11 + $0x438] sm:$0xf]  ;;  %v3185_v4 = vor.u32 %v3968_v61, %v3184_v57  ;;  %v3293_v39 = vor.u32 %v3995_v32, %v3292_v31  ;;  %v3400_v55 = vld [vmem:[#allocation11 + $0x408] sm:$0xf]  ;;  %v3901_v57 = vld [vmem:[#allocation11 + $0x4c] sm:$0xf] }
  0xb6   :  { %v3021_v50 = vor.u32 %v3925_v48, %v3018_v49  ;;  %v3280_v61 = vld [vmem:[#allocation11 + $0x318] sm:$0xf]  ;;  %v3961_v32 = vld [vmem:[#allocation11 + $0x22c] sm:$0xf]  ;;  %v4030_v48 = vld [vmem:[#allocation11 + $0x454] sm:$0xf] }
  0xb7   :  { %v3438_v49 = vld [vmem:[#allocation11 + $0x45c] sm:$0xf0] }
  0xb8   :  { %1600 = vmatpush.bf16.msra.mxu2 %v3245_v3  ;;  %1587 = vmatpush.bf16.msra.mxu1 %v3149_v6  ;;  %v4028_v3 = vld [vmem:[#allocation11 + $0x440] sm:$0xf0]  ;;  %v3089_v6 = vor.u32 %v3944_v63, %v3088_v62 }
  0xb9   :  { %1625 = vmatpush.bf16.msrb.mxu0 %v3449_v51  ;;  %1613 = vmatpush.bf16.msra.mxu3 %v3341_v52  ;;  %v3922_v51 = vld [vmem:[#allocation11 + $0xf4] sm:$0xf]  ;;  %v3006_v52 = vld [vmem:[#allocation11 + $0xfc] sm:$0xf0]  ;;  %v3992_v62 = vld [vmem:[#allocation11 + $0x320] sm:$0xf0] }
  0xba   :  { %v3009_v54 = vor.u32 %v3922_v51, %v3006_v52  ;;  %v3281_v63 = vor.u32 %v3992_v62, %v3280_v61  ;;  %v3985_v52 = vld [vmem:[#allocation11 + $0x2ec] sm:$0xf]  ;;  %v3441_v62 = vor.u32 %v4030_v48, %v3438_v49  ;;  %v3946_v48 = vld [vmem:[#allocation11 + $0x1b4] sm:$0xf]  ;;  %v3102_v49 = vld [vmem:[#allocation11 + $0x1bc] sm:$0xf0] }
  0xbc   :  { %1601 = vmatpush.bf16.msra.mxu2 %v3233_v15  ;;  %1588 = vmatpush.bf16.msra.mxu1 %v3137_v18  ;;  %v3425_v15 = vor.u32 %v4028_v3, %v3424_v2  ;;  %v4025_v18 = vld [vmem:[#allocation11 + $0x428] sm:$0xf0]  ;;  %v3388_v2 = vld [vmem:[#allocation11 + $0x3f0] sm:$0xf]  ;;  %v4019_v3 = vld [vmem:[#allocation11 + $0x3f8] sm:$0xf0] }
  0xbd   :  { %1626 = vmatpush.bf16.msrb.mxu0 %v3437_v0  ;;  %v3919_v0 = vld [vmem:[#allocation11 + $0xdc] sm:$0xf]  ;;  %v3389_v5 = vor.u32 %v4019_v3, %v3388_v2  ;;  %v3426_v3 = vld [vmem:[#allocation11 + $0x444] sm:$0xf0] }
  0xbe   :  { %v4027_v2 = vld [vmem:[#allocation11 + $0x43c] sm:$0xf] }
  0xbf   :  { %v3429_v12 = vor.u32 %v4027_v2, %v3426_v3  ;;  %v4015_v2 = vld [vmem:[#allocation11 + $0x3dc] sm:$0xf]  ;;  %v3378_v3 = vld [vmem:[#allocation11 + $0x3e4] sm:$0xf0] }
  0xc0   :  { %1602 = vmatpush.bf16.msra.mxu2 %v3221_v27  ;;  %1589 = vmatpush.bf16.msra.mxu1 %v3125_v29  ;;  %v3910_v27 = vld [vmem:[#allocation11 + $0x94] sm:$0xf]  ;;  %v3413_v29 = vor.u32 %v4025_v18, %v3412_v17  ;;  %v2898_v18 = vld [vmem:[#allocation11 + $0x24] sm:$0xf0] }
  0xc1   :  { %1627 = vmatpush.bf16.msrb.mxu0 %v3425_v15  ;;  %v2961_v35 = vor.u32 %v3910_v27, %v2958_v28  ;;  %v4016_v15 = vld [vmem:[#allocation11 + $0x3e0] sm:$0xf0]  ;;  %v250_v27 = vperm.slane %v4501_v26, 0  ;;  %v253_v28 = vperm.slane %v4501_v26, 3 }
  0xc2   :  { %562 = vmatmul.bf16.vlgmr.msrb.gmra.mxu1 %v4493_v53  ;;  %575 = vmatmul.bf16.vlgmr.msrb.gmra.mxu2 %v4493_v53  ;;  %v3329_v53 = vor.u32 %v4004_v60, %v3328_v59  ;;  %v2922_v59 = vld [vmem:[#allocation11 + $0x54] sm:$0xf0]  ;;  %v3377_v17 = vor.u32 %v4016_v15, %v3376_v14  ;;  %v3952_v14 = vld [vmem:[#allocation11 + $0x1e4] sm:$0xf]  ;;  %v3126_v15 = vld [vmem:[#allocation11 + $0x1ec] sm:$0xf0] }
  0xc3   :  { %v2925_v60 = vor.u32 %v3901_v57, %v2922_v59  ;;  %v3354_v59 = vld [vmem:[#allocation11 + $0x3b4] sm:$0xf0] }
  0xc4   :  { %1603 = vmatpush.bf16.msra.mxu2 %v3209_v42  ;;  %1590 = vmatpush.bf16.msra.mxu1 %v3113_v44  ;;  %v2949_v42 = vor.u32 %v3907_v37, %v2946_v38  ;;  %v3904_v44 = vld [vmem:[#allocation11 + $0x64] sm:$0xf]  ;;  %v251_v38 = vperm.slane %v4501_v26, 1 }
  0xc5   :  { %1614 = vmatpush.bf16.msra.mxu3 %v3329_v53  ;;  %1628 = vmatpush.bf16.msrb.mxu0 %v3413_v29  ;;  %v2937_v47 = vor.u32 %v3904_v44, %v2934_v45  ;;  %v2997_v53 = vor.u32 %v3919_v0, %v2994_v1  ;;  %v3958_v44 = vld [vmem:[#allocation11 + $0x214] sm:$0xf]  ;;  %v3150_v45 = vld [vmem:[#allocation11 + $0x21c] sm:$0xf0]  ;;  %v3138_v0 = vld [vmem:[#allocation11 + $0x204] sm:$0xf0] }
  0xc6   :  { %v3153_v57 = vor.u32 %v3958_v44, %v3150_v45  ;;  %v3318_v44 = vld [vmem:[#allocation11 + $0x36c] sm:$0xf0] }
  0xc8   :  { %1604 = vmatpush.bf16.msra.mxu2 %v3197_v56  ;;  %1591 = vmatpush.bf16.msra.mxu1 %v3101_v58  ;;  %v4022_v56 = vld [vmem:[#allocation11 + $0x410] sm:$0xf0] }
  0xc9   :  { %1615 = vmatpush.bf16.msra.mxu3 %v3317_v16  ;;  %v3401_v58 = vor.u32 %v4022_v56, %v3400_v55  ;;  %v3895_v16 = vld [vmem:[#allocation11 + $0x1c] sm:$0xf] }
  0xcb   :  { %1629 = vmatpush.bf16.msrb.mxu0 %v3401_v58  ;;  %v4009_v58 = vld [vmem:[#allocation11 + $0x3ac] sm:$0xf] }
  0xcc   :  { %1605 = vmatpush.bf16.msra.mxu2 %v3185_v4  ;;  %1592 = vmatpush.bf16.msra.mxu1 %v3089_v6  ;;  %v3898_v4 = vld [vmem:[#allocation11 + $0x34] sm:$0xf]  ;;  %v2910_v6 = vld [vmem:[#allocation11 + $0x3c] sm:$0xf0] }
  0xcd   :  { %1616 = vmatpush.bf16.msra.mxu3 %v3305_v30  ;;  %v2913_v7 = vor.u32 %v3898_v4, %v2910_v6  ;;  %v3982_v6 = vld [vmem:[#allocation11 + $0x2d4] sm:$0xf] }
  0xcf   :  { %1630 = vmatpush.bf16.msrb.mxu0 %v3389_v5  ;;  %v3357_v5 = vor.u32 %v4009_v58, %v3354_v59  ;;  %v3105_v59 = vor.u32 %v3946_v48, %v3102_v49  ;;  %v3939_v48 = vld [vmem:[#allocation11 + $0x178] sm:$0xf0] }
  0xd0   :  { %1606 = vmatpush.bf16.msra.mxu2 %v3173_v19  ;;  %1593 = vmatpush.bf16.msra.mxu1 %v3077_v20  ;;  %v2901_v19 = vor.u32 %v3895_v16, %v2898_v18  ;;  %v3364_v20 = vld [vmem:[#allocation11 + $0x3c0] sm:$0xf]  ;;  %v4024_v18 = vld [vmem:[#allocation11 + $0x424] sm:$0xf] }
  0xd1   :  { %1617 = vmatpush.bf16.msra.mxu3 %v3293_v39  ;;  %v3365_v22 = vor.u32 %v4013_v21, %v3364_v20 }
  0xd3   :  { %1631 = vmatpush.bf16.msrb.mxu0 %v3377_v17 }
  0xd4   :  { %1651 = vmatpush.bf16.msrb.mxu2 %v3069_v23  ;;  %1638 = vmatpush.bf16.msrb.mxu1 %v2973_v25  ;;  %v3892_v23 = vld [vmem:[#allocation11 + $0x4] sm:$0xf] }
  0xd5   :  { %1618 = vmatpush.bf16.msra.mxu3 %v3281_v63  ;;  %v2889_v25 = vor.u32 %v3892_v23, %v2886_v24  ;;  %v3955_v63 = vld [vmem:[#allocation11 + $0x1fc] sm:$0xf]  ;;  %v3234_v23 = vld [vmem:[#allocation11 + $0x2c4] sm:$0xf0] }
  0xd6   :  { %v3141_v9 = vor.u32 %v3955_v63, %v3138_v0  ;;  %v3943_v0 = vld [vmem:[#allocation11 + $0x19c] sm:$0xf] }
  0xd7   :  { %1632 = vmatpush.bf16.msrb.mxu0 %v3365_v22  ;;  %v3979_v22 = vld [vmem:[#allocation11 + $0x2bc] sm:$0xf] }
  0xd8   :  { %1652 = vmatpush.bf16.msrb.mxu2 %v3057_v33  ;;  %1639 = vmatpush.bf16.msrb.mxu1 %v2961_v35  ;;  %v3162_v33 = vld [vmem:[#allocation11 + $0x234] sm:$0xf0]  ;;  %v4033_v35 = vld [vmem:[#allocation11 + $0x46c] sm:$0xf] }
  0xd9   :  { %1619 = vmatpush.bf16.msra.mxu3 %v3269_v11  ;;  %v3165_v41 = vor.u32 %v3961_v32, %v3162_v33  ;;  %v3453_v43 = vor.u32 %v4033_v35, %v3450_v36  ;;  %v3342_v11 = vld [vmem:[#allocation11 + $0x39c] sm:$0xf0]  ;;  %v3114_v32 = vld [vmem:[#allocation11 + $0x1d4] sm:$0xf0]  ;;  %v3237_v33 = vor.u32 %v3979_v22, %v3234_v23  ;;  %v3264_v22 = vld [vmem:[#allocation11 + $0x2f0] sm:$0xf] }
  0xda   :  { %v3345_v21 = vor.u32 %v4006_v10, %v3342_v11  ;;  %v3402_v35 = vld [vmem:[#allocation11 + $0x414] sm:$0xf0]  ;;  %v3994_v11 = vld [vmem:[#allocation11 + $0x334] sm:$0xf] }
  0xdc   :  { %1653 = vmatpush.bf16.msrb.mxu2 %v3045_v40  ;;  %1640 = vmatpush.bf16.msrb.mxu1 %v2949_v42  ;;  %v252_v40 = vperm.slane %v4501_v26, 2 }
  0xe0   :  { %1654 = vmatpush.bf16.msrb.mxu2 %v3033_v46  ;;  %1641 = vmatpush.bf16.msrb.mxu1 %v2937_v47 }
  0xe4   :  { %1655 = vmatpush.bf16.msrb.mxu2 %v3021_v50  ;;  %1642 = vmatpush.bf16.msrb.mxu1 %v2925_v60 }
  0xe8   :  { %1656 = vmatpush.bf16.msrb.mxu2 %v3009_v54  ;;  %1643 = vmatpush.bf16.msrb.mxu1 %v2913_v7  ;;  %v3258_v54 = vld [vmem:[#allocation11 + $0x2f4] sm:$0xf0]  ;;  %v3246_v7 = vld [vmem:[#allocation11 + $0x2dc] sm:$0xf0] }
  0xe9   :  { %v3249_v17 = vor.u32 %v3982_v6, %v3246_v7  ;;  %v3970_v7 = vld [vmem:[#allocation11 + $0x274] sm:$0xf] }
  0xec   :  { %1657 = vmatpush.bf16.msrb.mxu2 %v2997_v53  ;;  %1644 = vmatpush.bf16.msrb.mxu1 %v2901_v19  ;;  %v3261_v53 = vor.u32 %v3985_v52, %v3258_v54  ;;  %v3414_v19 = vld [vmem:[#allocation11 + $0x42c] sm:$0xf0]  ;;  %v4018_v52 = vld [vmem:[#allocation11 + $0x3f4] sm:$0xf]  ;;  %v3390_v54 = vld [vmem:[#allocation11 + $0x3fc] sm:$0xf0] }
  0xed   :  { %v3393_v63 = vor.u32 %v4018_v52, %v3390_v54 }
  0xf0   :  { %1658 = vmatpush.bf16.msrb.mxu2 %v2985_v13  ;;  %1645 = vmatpush.bf16.msrb.mxu1 %v2889_v25  ;;  %v254_v13 = vperm.slane %v4501_v26, 4  ;;  %v3129_v25 = vor.u32 %v3952_v14, %v3126_v15  ;;  %v3381_v14 = vor.u32 %v4015_v2, %v3378_v3  ;;  %v3078_v15 = vld [vmem:[#allocation11 + $0x18c] sm:$0xf0]  ;;  %v2940_v2 = vld [vmem:[#allocation11 + $0x68] sm:$0xf] }
  0xf1   :  { %v3906_v3 = vld [vmem:[#allocation11 + $0x70] sm:$0xf0] }
 0x12f   :  { %v511_v29 = vpop.f32.mrf.mxu1 }
 0x130   :  { %v512_v30 = vadd.f32 %v511_v29, %v250_v27  ;;  %v550_v31 = vpop.f32.mrf.mxu0  ;;  %v4003_v27 = vld [vmem:[#allocation11 + $0x37c] sm:$0xf] }
 0x131   :  { %v551_v34 = vadd.f32 %v550_v31, %v253_v28  ;;  %v3330_v28 = vld [vmem:[#allocation11 + $0x384] sm:$0xf0]  ;;  %v3949_v31 = vld [vmem:[#allocation11 + $0x1cc] sm:$0xf] }
 0x132   :  { %v580_v37 = vmax.f32 %v512_v30, 0.0  ;;  %v3417_v30 = vor.u32 %v4024_v18, %v3414_v19 }
 0x133   :  { %v583_v39 = vmax.f32 %v551_v34, 0.0  ;;  %v4021_v34 = vld [vmem:[#allocation11 + $0x40c] sm:$0xf] }
 0x134   :  { %v4507_v42 = vpack.c.bf16 %v580_v37, %v580_v37  ;;  %v3333_v37 = vor.u32 %v4003_v27, %v3330_v28  ;;  %v3186_v27 = vld [vmem:[#allocation11 + $0x264] sm:$0xf0] }
 0x135   :  { %v4509_v46 = vpack.c.bf16 %v583_v39, %v583_v39  ;;  %v524_v47 = vpop.f32.mrf.mxu2  ;;  %v3976_v39 = vld [vmem:[#allocation11 + $0x2a4] sm:$0xf] }
 0x136   :  { %v525_v50 = vadd.f32 %v524_v47, %v251_v38  ;;  %v537_v51 = vpop.f32.mrf.mxu3  ;;  %1568 = vmatmul.bf16.vlgmr.msrb.gmra.mxu3 %v4507_v42  ;;  %v255_v38 = vperm.slane %v4501_v26, 5  ;;  %v3405_v47 = vor.u32 %v4021_v34, %v3402_v35 }
 0x137   :  { %v538_v55 = vadd.f32 %v537_v51, %v252_v40  ;;  %1607 = vmatmul.bf16.vlgmr.msra.gmra.mxu2 %v4509_v46  ;;  %1664 = vmatpush.bf16.msrb.mxu3 %v3165_v41  ;;  %v513_v56 = vpop.f32.mrf.mxu1  ;;  %v3222_v40 = vld [vmem:[#allocation11 + $0x2ac] sm:$0xf0]  ;;  %v3117_v41 = vor.u32 %v3949_v31, %v3114_v32 }
 0x138   :  { %v581_v60 = vmax.f32 %v525_v50, 0.0  ;;  %1703 = vmatpush.bf16.msra.mxu2 %v3453_v43  ;;  %v552_v61 = vpop.f32.mrf.mxu0  ;;  %v4000_v43 = vld [vmem:[#allocation11 + $0x364] sm:$0xf]  ;;  %v3225_v51 = vor.u32 %v3976_v39, %v3222_v40  ;;  %v3973_v56 = vld [vmem:[#allocation11 + $0x28c] sm:$0xf] }
 0x139   :  { %v582_v1 = vmax.f32 %v538_v55, 0.0  ;;  %v3321_v26 = vor.u32 %v4000_v43, %v3318_v44  ;;  %v3306_v61 = vld [vmem:[#allocation11 + $0x354] sm:$0xf0]  ;;  %v3964_v40 = vld [vmem:[#allocation11 + $0x244] sm:$0xf] }
 0x13a   :  { %v4513_v4 = vpack.c.bf16 %v581_v60, %v581_v60  ;;  %v3997_v60 = vld [vmem:[#allocation11 + $0x34c] sm:$0xf]  ;;  %v3988_v43 = vld [vmem:[#allocation11 + $0x304] sm:$0xf]  ;;  %v3270_v44 = vld [vmem:[#allocation11 + $0x30c] sm:$0xf0] }
 0x13b   :  { %v4515_v8 = vpack.c.bf16 %v582_v1, %v582_v1  ;;  %1665 = vmatpush.bf16.msrb.mxu3 %v3153_v57  ;;  %v3210_v57 = vld [vmem:[#allocation11 + $0x294] sm:$0xf0]  ;;  %v3090_v1 = vld [vmem:[#allocation11 + $0x1a4] sm:$0xf0]  ;;  %v3309_v6 = vor.u32 %v3997_v60, %v3306_v61 }
 0x13c   :  { %1704 = vmatpush.bf16.msra.mxu2 %v3441_v62  ;;  %1581 = vmatmul.bf16.vlgmr.msra.gmra.mxu0 %v4513_v4  ;;  %v3093_v10 = vor.u32 %v3943_v0, %v3090_v1  ;;  %v3060_v61 = vld [vmem:[#allocation11 + $0x158] sm:$0xf]  ;;  %v3960_v1 = vld [vmem:[#allocation11 + $0x220] sm:$0xf0] }
 0x13d   :  { %1594 = vmatmul.bf16.vlgmr.msra.gmra.mxu1 %v4515_v8  ;;  %1677 = vmatpush.bf16.msra.mxu0 %v3261_v53  ;;  %v526_v16 = vpop.f32.mrf.mxu2  ;;  %v3213_v53 = vor.u32 %v3973_v56, %v3210_v57  ;;  %v3273_v56 = vor.u32 %v3988_v43, %v3270_v44  ;;  %v3156_v0 = vld [vmem:[#allocation11 + $0x218] sm:$0xf]  ;;  %v2904_v43 = vld [vmem:[#allocation11 + $0x20] sm:$0xf]  ;;  %v3897_v44 = vld [vmem:[#allocation11 + $0x28] sm:$0xf0] }
 0x13e   :  { %1690 = vmatpush.bf16.msra.mxu1 %v3357_v5  ;;  %v539_v20 = vpop.f32.mrf.mxu3  ;;  %v4012_v16 = vld [vmem:[#allocation11 + $0x3c4] sm:$0xf] }
 0x13f   :  { %1666 = vmatpush.bf16.msrb.mxu3 %v3141_v9  ;;  %v563_v24 = vpop.f32.mrf.mxu1  ;;  %v3198_v9 = vld [vmem:[#allocation11 + $0x27c] sm:$0xf0]  ;;  %v2976_v20 = vld [vmem:[#allocation11 + $0xb0] sm:$0xf] }
 0x140   :  { %1705 = vmatpush.bf16.msra.mxu2 %v3429_v12  ;;  %v564_v29 = vadd.f32 %v563_v24, %v254_v13  ;;  %v3294_v12 = vld [vmem:[#allocation11 + $0x33c] sm:$0xf0]  ;;  %v3940_v13 = vld [vmem:[#allocation11 + $0x184] sm:$0xf]  ;;  %v3201_v19 = vor.u32 %v3970_v7, %v3198_v9  ;;  %v3987_v24 = vld [vmem:[#allocation11 + $0x2f8] sm:$0xf0] }
 0x141   :  { %1678 = vmatpush.bf16.msra.mxu0 %v3249_v17  ;;  %v3366_v17 = vld [vmem:[#allocation11 + $0x3cc] sm:$0xf0]  ;;  %v3297_v23 = vor.u32 %v3994_v11, %v3294_v12  ;;  %v3081_v28 = vor.u32 %v3940_v13, %v3078_v15  ;;  %v3265_v34 = vor.u32 %v3987_v24, %v3264_v22  ;;  %v3228_v7 = vld [vmem:[#allocation11 + $0x2a8] sm:$0xf]  ;;  %v3978_v9 = vld [vmem:[#allocation11 + $0x2b0] sm:$0xf0]  ;;  %v2941_v13 = vor.u32 %v3906_v3, %v2940_v2 }
 0x142   :  { %v584_v36 = vmax.f32 %v564_v29, 0.0  ;;  %1691 = vmatpush.bf16.msra.mxu1 %v3345_v21  ;;  %v3915_v21 = vld [vmem:[#allocation11 + $0xb8] sm:$0xf0]  ;;  %v3369_v31 = vor.u32 %v4012_v16, %v3366_v17  ;;  %v3048_v11 = vld [vmem:[#allocation11 + $0x140] sm:$0xf]  ;;  %v3229_v16 = vor.u32 %v3978_v9, %v3228_v7 }
 0x143   :  { %1667 = vmatpush.bf16.msrb.mxu3 %v3129_v25  ;;  %v3967_v25 = vld [vmem:[#allocation11 + $0x25c] sm:$0xf]  ;;  %v2977_v32 = vor.u32 %v3915_v21, %v2976_v20  ;;  %v3933_v12 = vld [vmem:[#allocation11 + $0x148] sm:$0xf0]  ;;  %v2928_v17 = vld [vmem:[#allocation11 + $0x50] sm:$0xf] }
 0x144   :  { %v4521_v45 = vpack.c.bf16 %v584_v36, %v584_v36  ;;  %1706 = vmatpush.bf16.msra.mxu2 %v3417_v30  ;;  %v3991_v29 = vld [vmem:[#allocation11 + $0x31c] sm:$0xf]  ;;  %v3282_v30 = vld [vmem:[#allocation11 + $0x324] sm:$0xf0]  ;;  %v3189_v35 = vor.u32 %v3967_v25, %v3186_v27  ;;  %v3912_v36 = vld [vmem:[#allocation11 + $0xa0] sm:$0xf0] }
 0x145   :  { %1679 = vmatpush.bf16.msra.mxu0 %v3237_v33  ;;  %v576_v50 = vpop.f32.mrf.mxu2  ;;  %v2964_v33 = vld [vmem:[#allocation11 + $0x98] sm:$0xf]  ;;  %v3285_v39 = vor.u32 %v3991_v29, %v3282_v30  ;;  %v3957_v15 = vld [vmem:[#allocation11 + $0x208] sm:$0xf0]  ;;  %v3216_v20 = vld [vmem:[#allocation11 + $0x290] sm:$0xf] }
 0x146   :  { %1692 = vmatpush.bf16.msra.mxu1 %v3333_v37  ;;  %v577_v55 = vadd.f32 %v576_v50, %v255_v38  ;;  %1620 = vmatmul.bf16.vlgmr.msra.gmra.mxu3 %v4521_v45  ;;  %v3252_v37 = vld [vmem:[#allocation11 + $0x2d8] sm:$0xf]  ;;  %v3984_v38 = vld [vmem:[#allocation11 + $0x2e0] sm:$0xf0]  ;;  %v2965_v49 = vor.u32 %v3912_v36, %v2964_v33  ;;  %v3168_v50 = vld [vmem:[#allocation11 + $0x230] sm:$0xf] }
 0x147   :  { %1659 = vmatmul.bf16.vlgmr.msrb.gmra.mxu2 %v4513_v4  ;;  %1668 = vmatpush.bf16.msrb.mxu3 %v3117_v41  ;;  %v565_v58 = vpop.f32.mrf.mxu1  ;;  %v3174_v41 = vld [vmem:[#allocation11 + $0x24c] sm:$0xf0]  ;;  %v3253_v52 = vor.u32 %v3984_v38, %v3252_v37  ;;  %v3975_v21 = vld [vmem:[#allocation11 + $0x298] sm:$0xf0]  ;;  %v3930_v24 = vld [vmem:[#allocation11 + $0x130] sm:$0xf0] }
 0x148   :  { %v585_v62 = vmax.f32 %v577_v55, 0.0  ;;  %1707 = vmatpush.bf16.msra.mxu2 %v3405_v47  ;;  %v3072_v47 = vld [vmem:[#allocation11 + $0x170] sm:$0xf]  ;;  %v3177_v54 = vor.u32 %v3964_v40, %v3174_v41  ;;  %v2952_v55 = vld [vmem:[#allocation11 + $0x80] sm:$0xf]  ;;  %v3217_v29 = vor.u32 %v3975_v21, %v3216_v20 }
 0x149   :  { %1680 = vmatpush.bf16.msra.mxu0 %v3225_v51  ;;  %v3963_v51 = vld [vmem:[#allocation11 + $0x238] sm:$0xf0]  ;;  %v3073_v57 = vor.u32 %v3939_v48, %v3072_v47  ;;  %v3240_v58 = vld [vmem:[#allocation11 + $0x2c0] sm:$0xf]  ;;  %v3132_v27 = vld [vmem:[#allocation11 + $0x1e8] sm:$0xf] }
 0x14a   :  { %v4525_v5 = vpack.c.bf16 %v585_v62, %v585_v62  ;;  %1693 = vmatpush.bf16.msra.mxu1 %v3321_v26  ;;  %v3909_v26 = vld [vmem:[#allocation11 + $0x88] sm:$0xf0]  ;;  %v3169_v60 = vor.u32 %v3963_v51, %v3168_v50  ;;  %v3936_v62 = vld [vmem:[#allocation11 + $0x160] sm:$0xf0]  ;;  %v2916_v30 = vld [vmem:[#allocation11 + $0x38] sm:$0xf] }
 0x14b   :  { %1669 = vmatpush.bf16.msrb.mxu3 %v3105_v59  ;;  %v3981_v59 = vld [vmem:[#allocation11 + $0x2c8] sm:$0xf0]  ;;  %v3204_v33 = vld [vmem:[#allocation11 + $0x278] sm:$0xf]  ;;  %v3024_v36 = vld [vmem:[#allocation11 + $0x110] sm:$0xf] }
 0x14c   :  { %1708 = vmatpush.bf16.msra.mxu2 %v3393_v63  ;;  %1633 = vmatmul.bf16.vlgmr.msrb.gmra.mxu0 %v4525_v5  ;;  %v2953_v63 = vor.u32 %v3909_v26, %v2952_v55  ;;  %v3927_v37 = vld [vmem:[#allocation11 + $0x118] sm:$0xf0]  ;;  %v3192_v48 = vld [vmem:[#allocation11 + $0x260] sm:$0xf]  ;;  %v3012_v51 = vld [vmem:[#allocation11 + $0xf8] sm:$0xf] }
 0x14d   :  { %1646 = vmatmul.bf16.vlgmr.msrb.gmra.mxu1 %v4507_v42  ;;  %1681 = vmatpush.bf16.msra.mxu0 %v3213_v53  ;;  %v578_v18 = vpop.f32.mrf.mxu2  ;;  %v3241_v53 = vor.u32 %v3981_v59, %v3240_v58  ;;  %v3951_v40 = vld [vmem:[#allocation11 + $0x1d8] sm:$0xf0]  ;;  %v3025_v47 = vor.u32 %v3927_v37, %v3024_v36  ;;  %v3108_v55 = vld [vmem:[#allocation11 + $0x1b8] sm:$0xf]  ;;  %v3948_v26 = vld [vmem:[#allocation11 + $0x1c0] sm:$0xf0] }
 0x14e   :  { %1694 = vmatpush.bf16.msra.mxu1 %v3309_v6  ;;  %v3061_v6 = vor.u32 %v3936_v62, %v3060_v61  ;;  %v3903_v18 = vld [vmem:[#allocation11 + $0x58] sm:$0xf0]  ;;  %v3894_v58 = vld [vmem:[#allocation11 + $0x10] sm:$0xf0]  ;;  %v3180_v59 = vld [vmem:[#allocation11 + $0x248] sm:$0xf] }
 0x14f   :  { %1670 = vmatpush.bf16.msrb.mxu3 %v3093_v10  ;;  %v3157_v10 = vor.u32 %v3960_v1, %v3156_v0  ;;  %v2929_v25 = vor.u32 %v3903_v18, %v2928_v17  ;;  %v3966_v61 = vld [vmem:[#allocation11 + $0x250] sm:$0xf0]  ;;  %v3360_v62 = vld [vmem:[#allocation11 + $0x3b0] sm:$0xf]  ;;  %v3109_v0 = vor.u32 %v3948_v26, %v3108_v55  ;;  %v3000_v1 = vld [vmem:[#allocation11 + $0xe0] sm:$0xf] }
 0x150   :  { %1709 = vmatpush.bf16.msra.mxu2 %v3381_v14  ;;  %v3144_v14 = vld [vmem:[#allocation11 + $0x200] sm:$0xf]  ;;  %v3181_v7 = vor.u32 %v3966_v61, %v3180_v59  ;;  %v3942_v17 = vld [vmem:[#allocation11 + $0x190] sm:$0xf0]  ;;  %v3456_v18 = vld [vmem:[#allocation11 + $0x470] sm:$0xf] }
 0x151   :  { %1682 = vmatpush.bf16.msra.mxu0 %v3201_v19  ;;  %v3049_v19 = vor.u32 %v3933_v12, %v3048_v11  ;;  %v3145_v22 = vor.u32 %v3957_v15, %v3144_v14  ;;  %v3096_v3 = vld [vmem:[#allocation11 + $0x1a0] sm:$0xf]  ;;  %v3348_v11 = vld [vmem:[#allocation11 + $0x398] sm:$0xf]  ;;  %v4008_v12 = vld [vmem:[#allocation11 + $0x3a0] sm:$0xf0] }
 0x152   :  { %1695 = vmatpush.bf16.msra.mxu1 %v3297_v23  ;;  %v3036_v23 = vld [vmem:[#allocation11 + $0x128] sm:$0xf]  ;;  %v3918_v15 = vld [vmem:[#allocation11 + $0xd0] sm:$0xf0]  ;;  %v3349_v20 = vor.u32 %v4008_v12, %v3348_v11  ;;  %v4029_v37 = vld [vmem:[#allocation11 + $0x448] sm:$0xf0] }
 0x153   :  { %1671 = vmatpush.bf16.msrb.mxu3 %v3081_v28  ;;  %v3954_v28 = vld [vmem:[#allocation11 + $0x1f0] sm:$0xf0]  ;;  %v2988_v14 = vld [vmem:[#allocation11 + $0xc8] sm:$0xf]  ;;  %v3508_v26 = vld [vmem:[#allocation13 + $0x60] sm:$0xf] }
 0x154   :  { %1710 = vmatpush.bf16.msra.mxu2 %v3369_v31  ;;  %v3900_v31 = vld [vmem:[#allocation11 + $0x40] sm:$0xf0]  ;;  %v2989_v21 = vor.u32 %v3918_v15, %v2988_v14  ;;  %v3993_v59 = vld [vmem:[#allocation11 + $0x328] sm:$0xf0]  ;;  %v4014_v11 = vld [vmem:[#allocation11 + $0x3d0] sm:$0xf0] }
 0x155   :  { %1683 = vmatpush.bf16.msra.mxu0 %v3189_v35  ;;  %v3133_v35 = vor.u32 %v3954_v28, %v3132_v27  ;;  %v2917_v38 = vor.u32 %v3900_v31, %v2916_v30  ;;  %v3444_v27 = vld [vmem:[#allocation11 + $0x458] sm:$0xf]  ;;  %v4032_v28 = vld [vmem:[#allocation11 + $0x460] sm:$0xf0]  ;;  %v3324_v30 = vld [vmem:[#allocation11 + $0x368] sm:$0xf] }
 0x156   :  { %1696 = vmatpush.bf16.msra.mxu1 %v3285_v39  ;;  %1672 = vmatmul.bf16.vlgmr.msrb.gmra.mxu3 %v4515_v8  ;;  %v3120_v39 = vld [vmem:[#allocation11 + $0x1d0] sm:$0xf]  ;;  %v4002_v31 = vld [vmem:[#allocation11 + $0x370] sm:$0xf0]  ;;  %v4057_v12 = vld [vmem:[#allocation13 + $0xac] sm:$0xf] }
 0x157   :  { %1716 = vmatpush.bf16.msra.mxu3 %v2977_v32  ;;  %1711 = vmatmul.bf16.vlgmr.msra.gmra.mxu2 %v4525_v5  ;;  %v3037_v32 = vor.u32 %v3930_v24, %v3036_v23  ;;  %v3121_v50 = vor.u32 %v3951_v40, %v3120_v39  ;;  %v4005_v23 = vld [vmem:[#allocation11 + $0x388] sm:$0xf0]  ;;  %v3312_v39 = vld [vmem:[#allocation11 + $0x350] sm:$0xf]  ;;  %v3999_v40 = vld [vmem:[#allocation11 + $0x358] sm:$0xf0] }
 0x158   :  { %1755 = vmatpush.bf16.msrb.mxu2 %v3265_v34  ;;  %v3972_v34 = vld [vmem:[#allocation11 + $0x280] sm:$0xf0] }
 0x159   :  { %1684 = vmatpush.bf16.msra.mxu0 %v3177_v54  ;;  %v3205_v41 = vor.u32 %v3972_v34, %v3204_v33  ;;  %v2905_v54 = vor.u32 %v3897_v44, %v2904_v43  ;;  %v4058_v33 = vld [vmem:[#allocation13 + $0xb0] sm:$0xf0]  ;;  %v3445_v34 = vor.u32 %v4032_v28, %v3444_v27  ;;  %v3420_v43 = vld [vmem:[#allocation11 + $0x428] sm:$0xf] }
 0x15a   :  { %1697 = vmatpush.bf16.msra.mxu1 %v3273_v56 }
 0x15b   :  { %1717 = vmatpush.bf16.msra.mxu3 %v2965_v49  ;;  %v3969_v49 = vld [vmem:[#allocation11 + $0x268] sm:$0xf0] }
 0x15c   :  { %1756 = vmatpush.bf16.msrb.mxu2 %v3253_v52  ;;  %1685 = vmatmul.bf16.vlgmr.msra.gmra.mxu0 %v4509_v46  ;;  %v3924_v52 = vld [vmem:[#allocation11 + $0x100] sm:$0xf0]  ;;  %v3193_v56 = vor.u32 %v3969_v49, %v3192_v48  ;;  %v3520_v48 = vld [vmem:[#allocation13 + $0x78] sm:$0xf] }
 0x15d   :  { %1729 = vmatpush.bf16.msrb.mxu0 %v3073_v57  ;;  %1698 = vmatmul.bf16.vlgmr.msra.gmra.mxu1 %v4521_v45  ;;  %v2892_v57 = vld [vmem:[#allocation11 + $0x8] sm:$0xf]  ;;  %v4052_v49 = vld [vmem:[#allocation13 + $0x80] sm:$0xf0] }
 0x15e   :  { %1742 = vmatpush.bf16.msrb.mxu1 %v3169_v60  ;;  %v3013_v60 = vor.u32 %v3924_v52, %v3012_v51  ;;  %v2893_v2 = vor.u32 %v3894_v58, %v2892_v57  ;;  %v3300_v51 = vld [vmem:[#allocation11 + $0x338] sm:$0xf]  ;;  %v3996_v52 = vld [vmem:[#allocation11 + $0x340] sm:$0xf0]  ;;  %v3521_v55 = vor.u32 %v4052_v49, %v3520_v48  ;;  %v3288_v58 = vld [vmem:[#allocation11 + $0x320] sm:$0xf] }
 0x15f   :  { %1718 = vmatpush.bf16.msra.mxu3 %v2953_v63  ;;  %v4011_v63 = vld [vmem:[#allocation11 + $0x3b8] sm:$0xf0]  ;;  %v3301_v57 = vor.u32 %v3996_v52, %v3300_v51  ;;  %v3474_v48 = vld [vmem:[#allocation13 + $0x24] sm:$0xf0]  ;;  %v4036_v52 = vld [vmem:[#allocation13 + $0x4] sm:$0xf] }
 0x160   :  { %1757 = vmatpush.bf16.msrb.mxu2 %v3241_v53  ;;  %v3921_v53 = vld [vmem:[#allocation11 + $0xe8] sm:$0xf0]  ;;  %v3361_v9 = vor.u32 %v4011_v63, %v3360_v62  ;;  %v3396_v62 = vld [vmem:[#allocation11 + $0x3f8] sm:$0xf]  ;;  %v4020_v63 = vld [vmem:[#allocation11 + $0x400] sm:$0xf0] }
 0x161   :  { %1730 = vmatpush.bf16.msrb.mxu0 %v3061_v6  ;;  %v3945_v6 = vld [vmem:[#allocation11 + $0x1a8] sm:$0xf0] }
 0x162   :  { %1743 = vmatpush.bf16.msrb.mxu1 %v3157_v10  ;;  %v3001_v10 = vor.u32 %v3921_v53, %v3000_v1  ;;  %v3276_v1 = vld [vmem:[#allocation11 + $0x308] sm:$0xf]  ;;  %v3990_v53 = vld [vmem:[#allocation11 + $0x310] sm:$0xf0] }
 0x163   :  { %1719 = vmatpush.bf16.msra.mxu3 %v2941_v13  ;;  %v3097_v13 = vor.u32 %v3945_v6, %v3096_v3  ;;  %v3384_v3 = vld [vmem:[#allocation11 + $0x3e0] sm:$0xf]  ;;  %v4017_v6 = vld [vmem:[#allocation11 + $0x3e8] sm:$0xf0] }
 0x164   :  { %1758 = vmatpush.bf16.msrb.mxu2 %v3229_v16  ;;  %v3084_v16 = vld [vmem:[#allocation11 + $0x188] sm:$0xf] }
 0x165   :  { %1731 = vmatpush.bf16.msrb.mxu0 %v3049_v19  ;;  %v4035_v19 = vld [vmem:[#allocation11 + $0x478] sm:$0xf0]  ;;  %v3085_v24 = vor.u32 %v3942_v17, %v3084_v16  ;;  %v4054_v16 = vld [vmem:[#allocation13 + $0x94] sm:$0xf]  ;;  %v3534_v17 = vld [vmem:[#allocation13 + $0x9c] sm:$0xf0] }
 0x166   :  { %1744 = vmatpush.bf16.msrb.mxu1 %v3145_v22  ;;  %v3336_v22 = vld [vmem:[#allocation11 + $0x380] sm:$0xf] }
 0x167   :  { %1720 = vmatpush.bf16.msra.mxu3 %v2929_v25  ;;  %v3457_v25 = vor.u32 %v4035_v19, %v3456_v18  ;;  %v3537_v18 = vor.u32 %v4054_v16, %v3534_v17  ;;  %v4051_v19 = vld [vmem:[#allocation13 + $0x7c] sm:$0xf]  ;;  %v3592_v17 = vld [vmem:[#allocation13 + $0x108] sm:$0xf] }
 0x168   :  { %1759 = vmatpush.bf16.msrb.mxu2 %v3217_v29  ;;  %v3337_v29 = vor.u32 %v4005_v23, %v3336_v22  ;;  %v4048_v22 = vld [vmem:[#allocation13 + $0x64] sm:$0xf]  ;;  %v3510_v23 = vld [vmem:[#allocation13 + $0x6c] sm:$0xf0] }
 0x169   :  { %1732 = vmatpush.bf16.msrb.mxu0 %v3037_v32  ;;  %v3544_v32 = vld [vmem:[#allocation13 + $0xa8] sm:$0xf]  ;;  %v3513_v28 = vor.u32 %v4048_v22, %v3510_v23  ;;  %v3594_v23 = vld [vmem:[#allocation13 + $0x114] sm:$0xf0] }
 0x16a   :  { %1745 = vmatpush.bf16.msrb.mxu1 %v3133_v35  ;;  %v3432_v35 = vld [vmem:[#allocation11 + $0x440] sm:$0xf]  ;;  %v3545_v36 = vor.u32 %v4058_v33, %v3544_v32 }
 0x16b   :  { %1721 = vmatpush.bf16.msra.mxu3 %v2917_v38  ;;  %v4055_v38 = vld [vmem:[#allocation13 + $0x98] sm:$0xf0] }
 0x16c   :  { %1760 = vmatpush.bf16.msrb.mxu2 %v3205_v41  ;;  %v3433_v41 = vor.u32 %v4029_v37, %v3432_v35  ;;  %v3472_v35 = vld [vmem:[#allocation13 + $0x18] sm:$0xf] }
 0x16d   :  { %1733 = vmatpush.bf16.msrb.mxu0 %v3025_v47  ;;  %v4026_v47 = vld [vmem:[#allocation11 + $0x430] sm:$0xf0] }
 0x16e   :  { %1746 = vmatpush.bf16.msrb.mxu1 %v3121_v50  ;;  %v3313_v50 = vor.u32 %v3999_v40, %v3312_v39 }
 0x16f   :  { %1722 = vmatpush.bf16.msra.mxu3 %v2905_v54  ;;  %v3408_v54 = vld [vmem:[#allocation11 + $0x410] sm:$0xf] }
 0x170   :  { %1761 = vmatpush.bf16.msrb.mxu2 %v3193_v56  ;;  %v4049_v56 = vld [vmem:[#allocation13 + $0x68] sm:$0xf0] }
 0x171   :  { %1734 = vmatpush.bf16.msrb.mxu0 %v3013_v60  ;;  %v3509_v61 = vor.u32 %v4049_v56, %v3508_v26  ;;  %v4079_v26 = vld [vmem:[#allocation13 + $0x158] sm:$0xf0] }
 0x172   :  { %1747 = vmatpush.bf16.msrb.mxu1 %v3109_v0  ;;  %v3289_v0 = vor.u32 %v3993_v59, %v3288_v58  ;;  %v3630_v58 = vld [vmem:[#allocation13 + $0x15c] sm:$0xf0] }
 0x173   :  { %1723 = vmatpush.bf16.msra.mxu3 %v2893_v2  ;;  %v3397_v2 = vor.u32 %v4020_v63, %v3396_v62  ;;  %v3636_v62 = vld [vmem:[#allocation13 + $0x158] sm:$0xf]  ;;  %v4080_v63 = vld [vmem:[#allocation13 + $0x160] sm:$0xf0] }
 0x174   :  { %1762 = vmatpush.bf16.msrb.mxu2 %v3181_v7  ;;  %v3277_v7 = vor.u32 %v3990_v53, %v3276_v1  ;;  %v4076_v1 = vld [vmem:[#allocation13 + $0x140] sm:$0xf0]  ;;  %v4075_v53 = vld [vmem:[#allocation13 + $0x13c] sm:$0xf] }
 0x175   :  { %1735 = vmatpush.bf16.msrb.mxu0 %v3001_v10  ;;  %v3372_v10 = vld [vmem:[#allocation11 + $0x3c8] sm:$0xf] }
 0x176   :  { %1748 = vmatpush.bf16.msrb.mxu1 %v3097_v13  ;;  %1724 = vmatmul.bf16.vlgmr.msra.gmra.mxu3 %v4507_v42  ;;  %v3532_v42 = vld [vmem:[#allocation13 + $0x90] sm:$0xf]  ;;  %v3546_v13 = vld [vmem:[#allocation13 + $0xb4] sm:$0xf0]  ;;  %v3373_v14 = vor.u32 %v4014_v11, %v3372_v10  ;;  %v4077_v10 = vld [vmem:[#allocation13 + $0x148] sm:$0xf0] }
 0x177   :  { %1768 = vmatpush.bf16.msrb.mxu3 %v3361_v9  ;;  %1763 = vmatmul.bf16.vlgmr.msrb.gmra.mxu2 %v4509_v46  ;;  %v3325_v46 = vor.u32 %v4002_v31, %v3324_v30  ;;  %v3533_v44 = vor.u32 %v4055_v38, %v3532_v42  ;;  %v3385_v9 = vor.u32 %v4017_v6, %v3384_v3  ;;  %v3484_v30 = vld [vmem:[#allocation13 + $0x30] sm:$0xf]  ;;  %v4043_v31 = vld [vmem:[#allocation13 + $0x38] sm:$0xf0]  ;;  %v3460_v42 = vld [vmem:[#allocation13] sm:$0xf] }
 0x178   :  { %v3549_v15 = vor.u32 %v4057_v12, %v3546_v13  ;;  %v3485_v32 = vor.u32 %v4043_v31, %v3484_v30  ;;  %v4037_v38 = vld [vmem:[#allocation13 + $0x8] sm:$0xf0]  ;;  %v3618_v3 = vld [vmem:[#allocation13 + $0x144] sm:$0xf0]  ;;  %v3604_v11 = vld [vmem:[#allocation13 + $0x120] sm:$0xf] }
 0x179   :  { %1736 = vmatpush.bf16.msrb.mxu0 %v2989_v21  ;;  %v3461_v40 = vor.u32 %v4037_v38, %v3460_v42  ;;  %v3621_v6 = vor.u32 %v4075_v53, %v3618_v3  ;;  %v4073_v12 = vld [vmem:[#allocation13 + $0x128] sm:$0xf0]  ;;  %v4072_v13 = vld [vmem:[#allocation13 + $0x124] sm:$0xf]  ;;  %v3600_v31 = vld [vmem:[#allocation13 + $0x110] sm:$0xf] }
 0x17a   :  { %1749 = vmatpush.bf16.msrb.mxu1 %v3085_v24  ;;  %v3496_v24 = vld [vmem:[#allocation13 + $0x48] sm:$0xf]  ;;  %v3582_v42 = vld [vmem:[#allocation13 + $0xfc] sm:$0xf0]  ;;  %v4062_v53 = vld [vmem:[#allocation13 + $0xd0] sm:$0xf0] }
 0x17b   :  { %1769 = vmatpush.bf16.msrb.mxu3 %v3349_v20  ;;  %v3522_v20 = vld [vmem:[#allocation13 + $0x84] sm:$0xf0]  ;;  %v4106_v3 = vld [vmem:[#allocation13 + $0x230] sm:$0xf0] }
 0x17c   :  { %1737 = vmatmul.bf16.vlgmr.msrb.gmra.mxu0 %v4513_v4  ;;  %v3421_v4 = vor.u32 %v4026_v47, %v3420_v43  ;;  %v3525_v21 = vor.u32 %v4051_v19, %v3522_v20  ;;  %v4081_v43 = vld [vmem:[#allocation13 + $0x16c] sm:$0xf]  ;;  %v4039_v47 = vld [vmem:[#allocation13 + $0x1c] sm:$0xf]  ;;  %v4542_v20 = vld [vmem:[%s4567_s6] sm:$0x7] }
 0x17d   :  { %1781 = vmatpush.bf16.msra.mxu0 %v3457_v25  ;;  %1750 = vmatmul.bf16.vlgmr.msrb.gmra.mxu1 %v4515_v8  ;;  %v4023_v8 = vld [vmem:[#allocation11 + $0x418] sm:$0xf0]  ;;  %v4046_v25 = vld [vmem:[#allocation13 + $0x50] sm:$0xf0]  ;;  %v3477_v51 = vor.u32 %v4039_v47, %v3474_v48  ;;  %v4069_v19 = vld [vmem:[#allocation13 + $0x10c] sm:$0xf] }
 0x17e   :  { %2288 = vmatpush.bf16.msra.mxu1 %v3545_v36  ;;  %v3409_v60 = vor.u32 %v4023_v8, %v3408_v54  ;;  %v3497_v27 = vor.u32 %v4046_v25, %v3496_v24  ;;  %v4040_v36 = vld [vmem:[#allocation13 + $0x20] sm:$0xf0]  ;;  %v3648_v54 = vld [vmem:[#allocation13 + $0x170] sm:$0xf]  ;;  %v3612_v24 = vld [vmem:[#allocation13 + $0x128] sm:$0xf] }
 0x17f   :  { %1770 = vmatpush.bf16.msrb.mxu3 %v3337_v29  ;;  %v3498_v29 = vld [vmem:[#allocation13 + $0x54] sm:$0xf0]  ;;  %v3473_v37 = vor.u32 %v4040_v36, %v3472_v35  ;;  %v3628_v8 = vld [vmem:[#allocation13 + $0x150] sm:$0xf]  ;;  %v4074_v25 = vld [vmem:[#allocation13 + $0x130] sm:$0xf0] }
 0x180   :  { %v3629_v56 = vor.u32 %v4079_v26, %v3628_v8  ;;  %v3613_v30 = vor.u32 %v4074_v25, %v3612_v24  ;;  %v4067_v35 = vld [vmem:[#allocation13 + $0xf8] sm:$0xf0]  ;;  %v4066_v36 = vld [vmem:[#allocation13 + $0xf4] sm:$0xf]  ;;  %v4065_v8 = vld [vmem:[#allocation13 + $0xe8] sm:$0xf0] }
 0x181   :  { %1782 = vmatpush.bf16.msra.mxu0 %v3445_v34  ;;  %v4042_v34 = vld [vmem:[#allocation13 + $0x34] sm:$0xf]  ;;  %v4063_v47 = vld [vmem:[#allocation13 + $0xdc] sm:$0xf] }
 0x182   :  { %2289 = vmatpush.bf16.msra.mxu1 %v3533_v44  ;;  %v3642_v44 = vld [vmem:[#allocation13 + $0x174] sm:$0xf0] }
 0x183   :  { %1771 = vmatpush.bf16.msrb.mxu3 %v3325_v46  ;;  %v3640_v46 = vld [vmem:[#allocation13 + $0x168] sm:$0xf] }
 0x185   :  { %1783 = vmatpush.bf16.msra.mxu0 %v3433_v41  ;;  %v4082_v41 = vld [vmem:[#allocation13 + $0x170] sm:$0xf0] }
 0x186   :  { %2290 = vmatpush.bf16.msra.mxu1 %v3521_v55  ;;  %v3641_v49 = vor.u32 %v4082_v41, %v3640_v46  ;;  %v4083_v55 = vld [vmem:[#allocation13 + $0x178] sm:$0xf0]  ;;  %v3585_v46 = vor.u32 %v4066_v36, %v3582_v42  ;;  %v4068_v41 = vld [vmem:[#allocation13 + $0x100] sm:$0xf0]  ;;  %v3700_v36 = vld [vmem:[#allocation13 + $0x1e0] sm:$0xf] }
 0x187   :  { %1772 = vmatpush.bf16.msrb.mxu3 %v3313_v50  ;;  %v3645_v50 = vor.u32 %v4081_v43, %v3642_v44  ;;  %v3568_v43 = vld [vmem:[#allocation13 + $0xd8] sm:$0xf]  ;;  %v4064_v44 = vld [vmem:[#allocation13 + $0xe0] sm:$0xf0] }
 0x188   :  { %2301 = vmatpush.bf16.msra.mxu2 %v3641_v49  ;;  %v3569_v48 = vor.u32 %v4064_v44, %v3568_v43  ;;  %v3570_v49 = vld [vmem:[#allocation13 + $0xe4] sm:$0xf0]  ;;  %v4107_v43 = vld [vmem:[#allocation13 + $0x238] sm:$0xf0] }
 0x189   :  { %1784 = vmatpush.bf16.msra.mxu0 %v3421_v4  ;;  %v3462_v4 = vld [vmem:[#allocation13 + $0xc] sm:$0xf0] }
 0x18a   :  { %2291 = vmatpush.bf16.msra.mxu1 %v3509_v61  ;;  %v3465_v59 = vor.u32 %v4036_v52, %v3462_v4  ;;  %v3649_v61 = vor.u32 %v4083_v55, %v3648_v54  ;;  %v3576_v55 = vld [vmem:[#allocation13 + $0xe0] sm:$0xf] }
 0x18b   :  { %1773 = vmatpush.bf16.msrb.mxu3 %v3301_v57  ;;  %v4078_v57 = vld [vmem:[#allocation13 + $0x154] sm:$0xf] }
 0x18c   :  { %2302 = vmatpush.bf16.msra.mxu2 %v3629_v56 }
 0x18d   :  { %1785 = vmatpush.bf16.msra.mxu0 %v3409_v60  ;;  %v3633_v60 = vor.u32 %v4078_v57, %v3630_v58  ;;  %v3556_v57 = vld [vmem:[#allocation13 + $0xc0] sm:$0xf]  ;;  %v4061_v58 = vld [vmem:[#allocation13 + $0xc8] sm:$0xf0] }
 0x18e   :  { %2292 = vmatpush.bf16.msra.mxu1 %v3497_v27  ;;  %v3597_v27 = vor.u32 %v4069_v19, %v3594_v23 }
 0x18f   :  { %1774 = vmatpush.bf16.msrb.mxu3 %v3289_v0  ;;  %v3616_v0 = vld [vmem:[#allocation13 + $0x138] sm:$0xf] }
 0x191   :  { %1786 = vmatpush.bf16.msra.mxu0 %v3397_v2  ;;  %v3617_v2 = vor.u32 %v4076_v1, %v3616_v0  ;;  %v3577_v0 = vor.u32 %v4065_v8, %v3576_v55  ;;  %v3564_v1 = vld [vmem:[#allocation13 + $0xc8] sm:$0xf]  ;;  %v4104_v8 = vld [vmem:[#allocation13 + $0x220] sm:$0xf0] }
 0x192   :  { %2293 = vmatpush.bf16.msra.mxu1 %v3485_v32  ;;  %v4071_v32 = vld [vmem:[#allocation13 + $0x118] sm:$0xf0] }
 0x193   :  { %1775 = vmatpush.bf16.msrb.mxu3 %v3277_v7  ;;  %v3637_v7 = vor.u32 %v4080_v63, %v3636_v62  ;;  %2303 = vmatpush.bf16.msra.mxu2 %v3617_v2  ;;  %v3736_v2 = vld [vmem:[#allocation13 + $0x228] sm:$0xf] }
 0x195   :  { %1787 = vmatpush.bf16.msra.mxu0 %v3385_v9  ;;  %v3624_v9 = vld [vmem:[#allocation13 + $0x140] sm:$0xf] }
 0x196   :  { %1776 = vmatmul.bf16.vlgmr.msrb.gmra.mxu3 %v4521_v45  ;;  %v4045_v45 = vld [vmem:[#allocation13 + $0x4c] sm:$0xf]  ;;  %2294 = vmatpush.bf16.msra.mxu1 %v3473_v37 }
 0x197   :  { %v3501_v33 = vor.u32 %v4045_v45, %v3498_v29 }
 0x199   :  { %1788 = vmatpush.bf16.msra.mxu0 %v3373_v14  ;;  %v3605_v14 = vor.u32 %v4073_v12, %v3604_v11 }
 0x19a   :  { %2295 = vmatpush.bf16.msra.mxu1 %v3461_v40  ;;  %v3588_v40 = vld [vmem:[#allocation13 + $0xf8] sm:$0xf] }
 0x19b   :  { %2304 = vmatpush.bf16.msra.mxu2 %v3605_v14  ;;  %v3589_v54 = vor.u32 %v4068_v41, %v3588_v40 }
 0x19c   :  { %1789 = vmatmul.bf16.vlgmr.msra.gmra.mxu0 %v4525_v5  ;;  %v3486_v5 = vld [vmem:[#allocation13 + $0x3c] sm:$0xf0] }
 0x19d   :  { %2327 = vmatpush.bf16.msrb.mxu0 %v3549_v15  ;;  %v3489_v39 = vor.u32 %v4042_v34, %v3486_v5  ;;  %v3606_v15 = vld [vmem:[#allocation13 + $0x12c] sm:$0xf0] }
 0x19e   :  { %2340 = vmatpush.bf16.msrb.mxu1 %v3645_v50  ;;  %v3609_v16 = vor.u32 %v4072_v13, %v3606_v15  ;;  %v3580_v5 = vld [vmem:[#allocation13 + $0xf0] sm:$0xf]  ;;  %v3565_v13 = vor.u32 %v4062_v53, %v3564_v1 }
 0x19f   :  { %v3581_v37 = vor.u32 %v4067_v35, %v3580_v5 }
 0x1a1   :  { %2328 = vmatpush.bf16.msrb.mxu0 %v3537_v18  ;;  %v4070_v18 = vld [vmem:[#allocation13 + $0x110] sm:$0xf0] }
 0x1a2   :  { %2341 = vmatpush.bf16.msrb.mxu1 %v3633_v60  ;;  %v3593_v22 = vor.u32 %v4070_v18, %v3592_v17  ;;  %v3557_v60 = vor.u32 %v4061_v58, %v3556_v57 }
 0x1a4   :  { %2305 = vmatpush.bf16.msra.mxu2 %v3593_v22  ;;  %v787_v22 = vperm.slane %v4542_v20, 1 }
 0x1a5   :  { %2329 = vmatpush.bf16.msrb.mxu0 %v3525_v21  ;;  %v3625_v21 = vor.u32 %v4077_v10, %v3624_v9  ;;  %v3737_v9 = vor.u32 %v4106_v3, %v3736_v2  ;;  %v4103_v10 = vld [vmem:[#allocation13 + $0x218] sm:$0xf0]  ;;  %v4101_v2 = vld [vmem:[#allocation13 + $0x208] sm:$0xf0]  ;;  %v3664_v3 = vld [vmem:[#allocation13 + $0x198] sm:$0xf] }
 0x1a6   :  { %2342 = vmatpush.bf16.msrb.mxu1 %v3621_v6  ;;  %v3724_v6 = vld [vmem:[#allocation13 + $0x210] sm:$0xf] }
 0x1a7   :  { %2314 = vmatpush.bf16.msra.mxu3 %v3737_v9  ;;  %v3725_v17 = vor.u32 %v4103_v10, %v3724_v6 }
 0x1a8   :  { %2306 = vmatpush.bf16.msra.mxu2 %v3581_v37  ;;  %v4097_v37 = vld [vmem:[#allocation13 + $0x1e8] sm:$0xf0] }
 0x1a9   :  { %2330 = vmatpush.bf16.msrb.mxu0 %v3513_v28  ;;  %v786_v28 = vperm.slane %v4542_v20, 0  ;;  %v3701_v42 = vor.u32 %v4097_v37, %v3700_v36  ;;  %v4092_v36 = vld [vmem:[#allocation13 + $0x1c0] sm:$0xf0] }
 0x1aa   :  { %2343 = vmatpush.bf16.msrb.mxu1 %v3609_v16 }
 0x1ab   :  { %2315 = vmatpush.bf16.msra.mxu3 %v3725_v17  ;;  %v4085_v17 = vld [vmem:[#allocation13 + $0x188] sm:$0xf0] }
 0x1ac   :  { %2307 = vmatpush.bf16.msra.mxu2 %v3569_v48  ;;  %v3688_v48 = vld [vmem:[#allocation13 + $0x1c8] sm:$0xf] }
 0x1ad   :  { %2331 = vmatpush.bf16.msrb.mxu0 %v3501_v33 }
 0x1ae   :  { %2344 = vmatpush.bf16.msrb.mxu1 %v3597_v27 }
 0x1b0   :  { %2308 = vmatpush.bf16.msra.mxu2 %v3557_v60 }
 0x1b1   :  { %2332 = vmatpush.bf16.msrb.mxu0 %v3489_v39  ;;  %v3601_v39 = vor.u32 %v4071_v32, %v3600_v31 }
 0x1b2   :  { %2345 = vmatpush.bf16.msrb.mxu1 %v3585_v46  ;;  %v3738_v46 = vld [vmem:[#allocation13 + $0x234] sm:$0xf0] }
 0x1b5   :  { %2333 = vmatpush.bf16.msrb.mxu0 %v3477_v51  ;;  %v3573_v51 = vor.u32 %v4063_v47, %v3570_v49  ;;  %v4094_v49 = vld [vmem:[#allocation13 + $0x1d0] sm:$0xf0] }
 0x1b7   :  { %2346 = vmatpush.bf16.msrb.mxu1 %v3573_v51  ;;  %v4102_v51 = vld [vmem:[#allocation13 + $0x214] sm:$0xf] }
 0x1b9   :  { %2334 = vmatpush.bf16.msrb.mxu0 %v3465_v59  ;;  %v1569_v45 = vpop.f32.mrf.mxu3  ;;  %v1582_v29 = vpop.f32.mrf.mxu0  ;;  %v4060_v59 = vld [vmem:[#allocation13 + $0xc4] sm:$0xf] }
 0x1ba   :  { %v1595_v33 = vpop.f32.mrf.mxu1  ;;  %v1608_v34 = vpop.f32.mrf.mxu2  ;;  %v1570_v38 = vadd.f32 %v1569_v45, %v786_v28  ;;  %v3712_v45 = vld [vmem:[#allocation13 + $0x1f8] sm:$0xf] }
 0x1bc   :  { %v1583_v50 = vadd.f32 %v1582_v29, %v1570_v38  ;;  %v4100_v29 = vld [vmem:[#allocation13 + $0x200] sm:$0xf0]  ;;  %v4105_v38 = vld [vmem:[#allocation13 + $0x22c] sm:$0xf] }
 0x1bd   :  { %2379 = vmatpush.bf16.msra.mxu0 %v3649_v61  ;;  %v3558_v61 = vld [vmem:[#allocation13 + $0xcc] sm:$0xf0]  ;;  %v3741_v41 = vor.u32 %v4105_v38, %v3738_v46  ;;  %v4087_v46 = vld [vmem:[#allocation13 + $0x19c] sm:$0xf] }
 0x1be   :  { %v1596_v62 = vadd.f32 %v1595_v33, %v1583_v50  ;;  %v3561_v63 = vor.u32 %v4060_v59, %v3558_v61  ;;  %v3689_v50 = vor.u32 %v4094_v49, %v3688_v48  ;;  %v4099_v61 = vld [vmem:[#allocation13 + $0x1fc] sm:$0xf] }
 0x1bf   :  { %2353 = vmatpush.bf16.msrb.mxu2 %v3741_v41 }
 0x1c0   :  { %2347 = vmatpush.bf16.msrb.mxu1 %v3561_v63  ;;  %v3720_v63 = vld [vmem:[#allocation13 + $0x200] sm:$0xf] }
 0x1c1   :  { %2380 = vmatpush.bf16.msra.mxu0 %v3637_v7  ;;  %v1571_v52 = vpop.f32.mrf.mxu3  ;;  %v1584_v4 = vpop.f32.mrf.mxu0  ;;  %v1609_v7 = vadd.f32 %v1608_v34, %v1596_v62  ;;  %v3714_v62 = vld [vmem:[#allocation13 + $0x204] sm:$0xf0]  ;;  %v3721_v10 = vor.u32 %v4101_v2, %v3720_v63 }
 0x1c2   :  { %v1597_v26 = vpop.f32.mrf.mxu1  ;;  %v1610_v56 = vpop.f32.mrf.mxu2  ;;  %v3726_v52 = vld [vmem:[#allocation13 + $0x21c] sm:$0xf0]  ;;  %v3732_v4 = vld [vmem:[#allocation13 + $0x218] sm:$0xf]  ;;  %v3717_v6 = vor.u32 %v4099_v61, %v3714_v62  ;;  %v3504_v61 = vld [vmem:[#allocation13 + $0x50] sm:$0xf] }
 0x1c3   :  { %v3729_v55 = vor.u32 %v4102_v51, %v3726_v52  ;;  %v3676_v26 = vld [vmem:[#allocation13 + $0x1b0] sm:$0xf]  ;;  %v4091_v56 = vld [vmem:[#allocation13 + $0x1b8] sm:$0xf0]  ;;  %v3733_v59 = vor.u32 %v4104_v8, %v3732_v4  ;;  %v3516_v8 = vld [vmem:[#allocation13 + $0x68] sm:$0xf] }
 0x1c4   :  { %v3677_v60 = vor.u32 %v4091_v56, %v3676_v26  ;;  %v4050_v56 = vld [vmem:[#allocation13 + $0x70] sm:$0xf0]  ;;  %v4047_v62 = vld [vmem:[#allocation13 + $0x58] sm:$0xf0] }
 0x1c5   :  { %2381 = vmatpush.bf16.msra.mxu0 %v3625_v21  ;;  %2354 = vmatpush.bf16.msrb.mxu2 %v3729_v55  ;;  %v3654_v55 = vld [vmem:[#allocation13 + $0x18c] sm:$0xf0]  ;;  %v3505_v63 = vor.u32 %v4047_v62, %v3504_v61 }
 0x1c9   :  { %2382 = vmatpush.bf16.msra.mxu0 %v3613_v30  ;;  %v1621_v11 = vpop.f32.mrf.mxu3  ;;  %v1634_v12 = vpop.f32.mrf.mxu0  ;;  %v3713_v30 = vor.u32 %v4100_v29, %v3712_v45  ;;  %2355 = vmatpush.bf16.msrb.mxu2 %v3717_v6  ;;  %v4095_v45 = vld [vmem:[#allocation13 + $0x1d8] sm:$0xf0] }
 0x1ca   :  { %v1622_v14 = vadd.f32 %v1621_v11, %v1609_v7  ;;  %v1647_v15 = vpop.f32.mrf.mxu1  ;;  %v1660_v16 = vpop.f32.mrf.mxu2  ;;  %v4088_v7 = vld [vmem:[#allocation13 + $0x1a0] sm:$0xf0] }
 0x1cb   :  { %v1648_v28 = vadd.f32 %v1647_v15, %v787_v22  ;;  %2316 = vmatpush.bf16.msra.mxu3 %v3713_v30  ;;  %v4096_v11 = vld [vmem:[#allocation13 + $0x1e4] sm:$0xf]  ;;  %v4098_v15 = vld [vmem:[#allocation13 + $0x1f0] sm:$0xf0]  ;;  %v4059_v22 = vld [vmem:[#allocation13 + $0xb8] sm:$0xf0] }
 0x1cc   :  { %v1635_v18 = vadd.f32 %v1634_v12, %v1622_v14  ;;  %v3702_v12 = vld [vmem:[#allocation13 + $0x1ec] sm:$0xf0]  ;;  %v3708_v14 = vld [vmem:[#allocation13 + $0x1e8] sm:$0xf] }
 0x1cd   :  { %2383 = vmatpush.bf16.msra.mxu0 %v3601_v39  ;;  %v1661_v31 = vadd.f32 %v1660_v16, %v1648_v28  ;;  %v3744_v39 = vld [vmem:[#allocation13 + $0x230] sm:$0xf]  ;;  %v3652_v16 = vld [vmem:[#allocation13 + $0x180] sm:$0xf] }
 0x1ce   :  { %v1794_v19 = vmax.f32 %v1635_v18, 0.0  ;;  %v3745_v44 = vor.u32 %v4107_v43, %v3744_v39  ;;  %v3705_v18 = vor.u32 %v4096_v11, %v3702_v12  ;;  %v3696_v28 = vld [vmem:[#allocation13 + $0x1d0] sm:$0xf]  ;;  %v3666_v39 = vld [vmem:[#allocation13 + $0x1a4] sm:$0xf0]  ;;  %v788_v11 = vperm.slane %v4542_v20, 2 }
 0x1cf   :  { %2317 = vmatpush.bf16.msra.mxu3 %v3701_v42  ;;  %v3669_v41 = vor.u32 %v4087_v46, %v3666_v39  ;;  %v4053_v43 = vld [vmem:[#allocation13 + $0x88] sm:$0xf0]  ;;  %v4119_v46 = vld [vmem:[#allocation14 + $0x58] sm:$0xff] }
 0x1d0   :  { %v4545_v21 = vpack.c.bf16 %v1794_v19, %v1794_v19  ;;  %v3552_v19 = vld [vmem:[#allocation13 + $0xb0] sm:$0xf]  ;;  %2356 = vmatpush.bf16.msrb.mxu2 %v3705_v18 }
 0x1d1   :  { %2384 = vmatpush.bf16.msra.mxu0 %v3589_v54  ;;  %v1623_v23 = vpop.f32.mrf.mxu3  ;;  %v1636_v24 = vpop.f32.mrf.mxu0  ;;  %v3553_v29 = vor.u32 %v4059_v22, %v3552_v19 }
 0x1d2   :  { %v1649_v25 = vpop.f32.mrf.mxu1  ;;  %v1662_v27 = vpop.f32.mrf.mxu2  ;;  %2296 = vmatmul.bf16.vlgmr.msra.gmra.mxu1 %v4545_v21  ;;  %2335 = vmatmul.bf16.vlgmr.msrb.gmra.mxu0 %v4545_v21  ;;  %v3709_v23 = vor.u32 %v4098_v15, %v3708_v14  ;;  %v4093_v24 = vld [vmem:[#allocation13 + $0x1cc] sm:$0xf]  ;;  %v4038_v14 = vld [vmem:[#allocation13 + $0x10] sm:$0xf0] }
 0x1d3   :  { %2392 = vmatpush.bf16.msra.mxu1 %v3745_v44  ;;  %2318 = vmatpush.bf16.msra.mxu3 %v3689_v50  ;;  %v3690_v25 = vld [vmem:[#allocation13 + $0x1d4] sm:$0xf0]  ;;  %v3653_v27 = vor.u32 %v4085_v17, %v3652_v16  ;;  %v3672_v44 = vld [vmem:[#allocation13 + $0x1a0] sm:$0xf] }
 0x1d4   :  { %v3693_v30 = vor.u32 %v4093_v24, %v3690_v25 }
 0x1d5   :  { %2385 = vmatpush.bf16.msra.mxu0 %v3577_v0 }
 0x1d6   :  { %2357 = vmatpush.bf16.msrb.mxu2 %v3693_v30 }
 0x1d7   :  { %2393 = vmatpush.bf16.msra.mxu1 %v3733_v59  ;;  %2319 = vmatpush.bf16.msra.mxu3 %v3677_v60  ;;  %v3517_v59 = vor.u32 %v4050_v56, %v3516_v8  ;;  %v4129_v8 = vld [vmem:[#allocation14 + $0xa8] sm:$0xff]  ;;  %v4127_v56 = vld [vmem:[#allocation14 + $0x98] sm:$0xff] }
 0x1d9   :  { %2386 = vmatpush.bf16.msra.mxu0 %v3565_v13  ;;  %v1673_v32 = vpop.f32.mrf.mxu3  ;;  %v1686_v33 = vpop.f32.mrf.mxu0  ;;  %v3665_v13 = vor.u32 %v4088_v7, %v3664_v3 }
 0x1da   :  { %v1674_v34 = vadd.f32 %v1673_v32, %v1661_v31  ;;  %v1699_v5 = vpop.f32.mrf.mxu1  ;;  %v1712_v35 = vpop.f32.mrf.mxu2  ;;  %v3540_v31 = vld [vmem:[#allocation13 + $0x98] sm:$0xf]  ;;  %v4056_v32 = vld [vmem:[#allocation13 + $0xa0] sm:$0xf0] }
 0x1db   :  { %2394 = vmatpush.bf16.msra.mxu1 %v3721_v10  ;;  %2320 = vmatpush.bf16.msra.mxu3 %v3665_v13  ;;  %v3541_v37 = vor.u32 %v4056_v32, %v3540_v31  ;;  %v4041_v10 = vld [vmem:[#allocation13 + $0x28] sm:$0xf0]  ;;  %v3468_v13 = vld [vmem:[#allocation13 + $0x8] sm:$0xf]  ;;  %v4115_v31 = vld [vmem:[#allocation14 + $0x38] sm:$0xff] }
 0x1dc   :  { %v1687_v40 = vadd.f32 %v1686_v33, %v1674_v34  ;;  %v3697_v33 = vor.u32 %v4095_v45, %v3696_v28  ;;  %v4090_v34 = vld [vmem:[#allocation13 + $0x1b4] sm:$0xf]  ;;  %v3469_v16 = vor.u32 %v4038_v14, %v3468_v13  ;;  %v4123_v32 = vld [vmem:[#allocation14 + $0x78] sm:$0xff] }
 0x1de   :  { %v1700_v47 = vadd.f32 %v1699_v5, %v1687_v40  ;;  %v3678_v5 = vld [vmem:[#allocation13 + $0x1bc] sm:$0xf0] }
 0x1df   :  { %2395 = vmatpush.bf16.msra.mxu1 %v3709_v23  ;;  %2321 = vmatpush.bf16.msra.mxu3 %v3653_v27  ;;  %v3681_v42 = vor.u32 %v4090_v34, %v3678_v5  ;;  %v3528_v40 = vld [vmem:[#allocation13 + $0x80] sm:$0xf]  ;;  %v4122_v34 = vld [vmem:[#allocation14 + $0x70] sm:$0xff] }
 0x1e0   :  { %v1713_v54 = vadd.f32 %v1712_v35, %v1700_v47  ;;  %v3684_v35 = vld [vmem:[#allocation13 + $0x1b8] sm:$0xf]  ;;  %v4089_v47 = vld [vmem:[#allocation13 + $0x1a8] sm:$0xf0]  ;;  %v3529_v48 = vor.u32 %v4053_v43, %v3528_v40 }
 0x1e1   :  { %v1675_v57 = vpop.f32.mrf.mxu3  ;;  %v1688_v58 = vpop.f32.mrf.mxu0  ;;  %v3685_v38 = vor.u32 %v4092_v36, %v3684_v35  ;;  %2358 = vmatpush.bf16.msrb.mxu2 %v3681_v42  ;;  %v3673_v49 = vor.u32 %v4089_v47, %v3672_v44  ;;  %v4113_v36 = vld [vmem:[#allocation14 + $0x28] sm:$0xff]  ;;  %v4112_v42 = vld [vmem:[#allocation14 + $0x20] sm:$0xff] }
 0x1e2   :  { %v1795_v0 = vmax.f32 %v1713_v54, 0.0  ;;  %v1701_v1 = vpop.f32.mrf.mxu1  ;;  %v1714_v53 = vpop.f32.mrf.mxu2  ;;  %v4084_v54 = vld [vmem:[#allocation13 + $0x184] sm:$0xf]  ;;  %v3660_v57 = vld [vmem:[#allocation13 + $0x188] sm:$0xf] }
 0x1e3   :  { %2366 = vmatpush.bf16.msrb.mxu3 %v3553_v29  ;;  %2396 = vmatpush.bf16.msra.mxu1 %v3697_v33  ;;  %v3657_v26 = vor.u32 %v4084_v54, %v3654_v55  ;;  %v4086_v58 = vld [vmem:[#allocation13 + $0x190] sm:$0xf0]  ;;  %v4044_v1 = vld [vmem:[#allocation13 + $0x40] sm:$0xf0] }
 0x1e4   :  { %v1798_v9 = vpack.c.bf16 %v1795_v0, %v1795_v0  ;;  %v3661_v60 = vor.u32 %v4086_v58, %v3660_v57  ;;  %v3492_v0 = vld [vmem:[#allocation13 + $0x38] sm:$0xf]  ;;  %v4114_v33 = vld [vmem:[#allocation14 + $0x30] sm:$0xff]  ;;  %v4108_v54 = vld [vmem:[#allocation14] sm:$0xff] }
 0x1e5   :  { %2359 = vmatpush.bf16.msrb.mxu2 %v3669_v41  ;;  %v3493_v7 = vor.u32 %v4044_v1, %v3492_v0  ;;  %v4116_v55 = vld [vmem:[#allocation14 + $0x40] sm:$0xff]  ;;  %v4126_v57 = vld [vmem:[#allocation14 + $0x90] sm:$0xff]  ;;  %v4125_v58 = vld [vmem:[#allocation14 + $0x88] sm:$0xff] }
 0x1e6   :  { %2309 = vmatmul.bf16.vlgmr.msra.gmra.mxu2 %v1798_v9  ;;  %2348 = vmatmul.bf16.vlgmr.msrb.gmra.mxu1 %v1798_v9 }
 0x1e7   :  { %2387 = vmatmul.bf16.vlgmr.msra.gmra.mxu0 %v1798_v9  ;;  %2367 = vmatpush.bf16.msrb.mxu3 %v3541_v37  ;;  %v3480_v9 = vld [vmem:[#allocation13 + $0x20] sm:$0xf]  ;;  %v4121_v37 = vld [vmem:[#allocation14 + $0x68] sm:$0xff] }
 0x1e8   :  { %2397 = vmatpush.bf16.msra.mxu1 %v3685_v38  ;;  %v3481_v12 = vor.u32 %v4041_v10, %v3480_v9  ;;  %v4120_v38 = vld [vmem:[#allocation14 + $0x60] sm:$0xff] }
 0x1e9   :  { %2360 = vmatpush.bf16.msrb.mxu2 %v3657_v26  ;;  %v4128_v26 = vld [vmem:[#allocation14 + $0xa0] sm:$0xff] }
 0x1eb   :  { %2368 = vmatpush.bf16.msrb.mxu3 %v3529_v48  ;;  %v4110_v48 = vld [vmem:[#allocation14 + $0x10] sm:$0xff] }
 0x1ec   :  { %2398 = vmatpush.bf16.msra.mxu1 %v3673_v49  ;;  %v4118_v49 = vld [vmem:[#allocation14 + $0x50] sm:$0xff] }
 0x1ed   :  { %2607 = vmatpush.bf16.msra.mxu2 %v4115_v31 }
 0x1ef   :  { %2369 = vmatpush.bf16.msrb.mxu3 %v3517_v59  ;;  %v1896_v59 = vld [vmem:[%s4569_s8] sm:$0x7] }
 0x1f0   :  { %2399 = vmatpush.bf16.msra.mxu1 %v3661_v60  ;;  %v4124_v60 = vld [vmem:[#allocation14 + $0x80] sm:$0xff]  ;;  %v1898_v61 = vperm.slane %v1896_v59, 0  ;;  %v1899_v62 = vperm.slane %v1896_v59, 1 }
 0x1f1   :  { %2608 = vmatpush.bf16.msra.mxu2 %v4114_v33 }
 0x1f3   :  { %2370 = vmatpush.bf16.msrb.mxu3 %v3505_v63 }
 0x1f5   :  { %2609 = vmatpush.bf16.msra.mxu2 %v4113_v36 }
 0x1f7   :  { %2371 = vmatpush.bf16.msrb.mxu3 %v3493_v7 }
 0x1f9   :  { %v1725_v50 = vpop.f32.mrf.mxu3  ;;  %v1738_v51 = vpop.f32.mrf.mxu0  ;;  %2610 = vmatpush.bf16.msra.mxu2 %v4112_v42 }
 0x1fa   :  { %v1751_v52 = vpop.f32.mrf.mxu1  ;;  %v1764_v4 = vpop.f32.mrf.mxu2  ;;  %v1726_v15 = vadd.f32 %v1725_v50, %v788_v11  ;;  %v4131_v50 = vld [vmem:[#allocation14 + $0xb8] sm:$0xff] }
 0x1fb   :  { %2372 = vmatpush.bf16.msrb.mxu3 %v3481_v12  ;;  %2633 = vmatpush.bf16.msrb.mxu0 %v4131_v50 }
 0x1fc   :  { %v1739_v17 = vadd.f32 %v1738_v51, %v1726_v15  ;;  %v4109_v51 = vld [vmem:[#allocation14 + $0x8] sm:$0xff] }
 0x1fe   :  { %v1752_v18 = vadd.f32 %v1751_v52, %v1739_v17  ;;  %v4117_v52 = vld [vmem:[#allocation14 + $0x48] sm:$0xff]  ;;  %v1900_v17 = vperm.slane %v1896_v59, 2 }
 0x1ff   :  { %2373 = vmatpush.bf16.msrb.mxu3 %v3469_v16 }
 0x200   :  { %v1765_v19 = vadd.f32 %v1764_v4, %v1752_v18  ;;  %v4130_v4 = vld [vmem:[#allocation14 + $0xb0] sm:$0xff] }
 0x201   :  { %v1727_v53 = vpop.f32.mrf.mxu3  ;;  %v1740_v2 = vpop.f32.mrf.mxu0  ;;  %2634 = vmatpush.bf16.msrb.mxu0 %v4130_v4 }
 0x202   :  { %v1753_v3 = vpop.f32.mrf.mxu1  ;;  %v1766_v6 = vpop.f32.mrf.mxu2 }
 0x205   :  { %2635 = vmatpush.bf16.msrb.mxu0 %v4129_v8 }
 0x209   :  { %2636 = vmatpush.bf16.msrb.mxu0 %v4128_v26 }
 0x20d   :  { %2637 = vmatpush.bf16.msrb.mxu0 %v4127_v56 }
 0x211   :  { %2638 = vmatpush.bf16.msrb.mxu0 %v4126_v57 }
 0x215   :  { %2639 = vmatpush.bf16.msrb.mxu0 %v4125_v58 }
 0x219   :  { %v1777_v22 = vpop.f32.mrf.mxu3  ;;  %v1790_v23 = vpop.f32.mrf.mxu0  ;;  %2640 = vmatpush.bf16.msrb.mxu0 %v4124_v60 }
 0x21a   :  { %v1778_v24 = vadd.f32 %v1777_v22, %v1765_v19 }
 0x21c   :  { %v1791_v25 = vadd.f32 %v1790_v23, %v1778_v24 }
 0x21e   :  { %v1796_v27 = vmax.f32 %v1791_v25, 0.0 }
 0x220   :  { %v1799_v28 = vpack.c.bf16 %v1796_v27, %v1796_v27 }
 0x221   :  { %v1779_v45 = vpop.f32.mrf.mxu3  ;;  %v1792_v29 = vpop.f32.mrf.mxu0 }
 0x222   :  { %2322 = vmatmul.bf16.vlgmr.msra.gmra.mxu3 %v1799_v28  ;;  %2361 = vmatmul.bf16.vlgmr.msrb.gmra.mxu2 %v1799_v28  ;;  %v4148_v29 = vld [vmem:[%s4571_s10] ss:$0 sm:$0xff] }
 0x223   :  { %2400 = vmatmul.bf16.vlgmr.msra.gmra.mxu1 %v1799_v28  ;;  %2620 = vmatpush.bf16.msra.mxu3 %v4123_v32 }
 0x227   :  { %2621 = vmatpush.bf16.msra.mxu3 %v4122_v34 }
 0x22b   :  { %2622 = vmatpush.bf16.msra.mxu3 %v4121_v37 }
 0x22f   :  { %2623 = vmatpush.bf16.msra.mxu3 %v4120_v38 }
 0x232   :  { %2374 = vmatmul.bf16.vlgmr.msrb.gmra.mxu3 %v4545_v21  ;;  %v4111_v21 = vld [vmem:[#allocation14 + $0x18] sm:$0xff] }
 0x233   :  { %2611 = vmatpush.bf16.msra.mxu2 %v4111_v21  ;;  %2624 = vmatpush.bf16.msra.mxu3 %v4119_v46 }
 0x237   :  { %2612 = vmatpush.bf16.msra.mxu2 %v4110_v48  ;;  %2625 = vmatpush.bf16.msra.mxu3 %v4118_v49 }
 0x23b   :  { %2613 = vmatpush.bf16.msra.mxu2 %v4109_v51  ;;  %2626 = vmatpush.bf16.msra.mxu3 %v4117_v52 }
 0x23f   :  { %2614 = vmatpush.bf16.msra.mxu2 %v4108_v54  ;;  %2627 = vmatpush.bf16.msra.mxu3 %v4116_v55 }
 0x24f   :  { %v2297_v20 = vpop.f32.mrf.mxu1  ;;  %v2336_v30 = vpop.f32.mrf.mxu0 }
 0x250   :  { %v2298_v0 = vadd.f32 %v2297_v20, %v1898_v61  ;;  %v2337_v1 = vadd.f32 %v2336_v30, %v1899_v62 }
 0x257   :  { %v2299_v5 = vpop.f32.mrf.mxu1  ;;  %v2338_v35 = vpop.f32.mrf.mxu0 }
 0x263   :  { %v2349_v39 = vpop.f32.mrf.mxu1 }
 0x264   :  { %v2388_v40 = vpop.f32.mrf.mxu0  ;;  %v2350_v53 = vadd.f32 %v2349_v39, %v2337_v1 }
 0x269   :  { %v2310_v41 = vpop.f32.mrf.mxu2 }
 0x26a   :  { %v2311_v2 = vadd.f32 %v2310_v41, %v2298_v0 }
 0x26b   :  { %v2351_v43 = vpop.f32.mrf.mxu1 }
 0x26c   :  { %v2390_v44 = vpop.f32.mrf.mxu0 }
 0x271   :  { %v2312_v47 = vpop.f32.mrf.mxu2 }
 0x2a0   :  { %v2401_v63 = vpop.f32.mrf.mxu1 }
 0x2a5   :  { %v2323_v3 = vpop.f32.mrf.mxu3  ;;  %v2362_v6 = vpop.f32.mrf.mxu2 }
 0x2a6   :  { %v2324_v7 = vadd.f32 %v2323_v3, %v2311_v2  ;;  %v2363_v9 = vadd.f32 %v2362_v6, %v2350_v53 }
 0x2a8   :  { %v2405_v10 = vmax.f32 %v2324_v7, 0.0  ;;  %v2406_v11 = vmax.f32 %v2363_v9, 0.0  ;;  %v2403_v12 = vpop.f32.mrf.mxu1 }
 0x2aa   :  { %v2408_v13 = vpack.c.bf16 %v2405_v10, %v2405_v10  ;;  %v2409_v14 = vpack.c.bf16 %v2406_v11, %v2406_v11 }
 0x2ac   :  { %2615 = vmatmul.bf16.vlgmr.msra.gmra.mxu2 %v2408_v13  ;;  %2628 = vmatmul.bf16.vlgmr.msra.gmra.mxu3 %v2409_v14 }
 0x2ad   :  { %v2325_v15 = vpop.f32.mrf.mxu3  ;;  %v2364_v16 = vpop.f32.mrf.mxu2 }
 0x2b5   :  { %v2375_v18 = vpop.f32.mrf.mxu3 }
 0x2b6   :  { %v2376_v19 = vadd.f32 %v2375_v18, %v1900_v17 }
 0x2b8   :  { %v2389_v22 = vadd.f32 %v2388_v40, %v2376_v19 }
 0x2ba   :  { %v2402_v23 = vadd.f32 %v2401_v63, %v2389_v22 }
 0x2bc   :  { %v2407_v24 = vmax.f32 %v2402_v23, 0.0 }
 0x2bd   :  { %v2377_v25 = vpop.f32.mrf.mxu3 }
 0x2be   :  { %v2410_v27 = vpack.c.bf16 %v2407_v24, %v2407_v24 }
 0x2c0   :  { %2641 = vmatmul.bf16.vlgmr.msrb.gmra.mxu0 %v2410_v27 }
 0x32f   :  { %v2616_v28 = vpop.f32.mrf.mxu2  ;;  %v2629_v45 = vpop.f32.mrf.mxu3 }
 0x330   :  { %v2617_v31 = vadd.f32 %v4148_v29, %v2616_v28 }
 0x332   :  { %v2630_v32 = vadd.f32 %v2629_v45, %v2617_v31 }
 0x337   :  { %v2618_v20 = vpop.f32.mrf.mxu2  ;;  %v2631_v30 = vpop.f32.mrf.mxu3 }
 0x33d   :  { %v2642_v33 = vpop.f32.mrf.mxu0 }
 0x33e   :  { %v2643_v34 = vadd.f32 %v2642_v33, %v2630_v32 }
 0x340   :  { %v2647_v5 = vmul.f32 1.442695, %v2643_v34  ;;  %vm2646_vm2 = vcmp.gt.f32.partialorder %v2643_v34, 20.0 }
 0x342   :  { %4149 = vpow2.f32 %v2647_v5 }
 0x345   :  { %v2644_v35 = vpop.f32.mrf.mxu0 }
 0x348   :  { %v4150_v36 = vpop.eup %4149 }
 0x349   :  { %v2649_v37 = vadd.f32 1.0, %v4150_v36  ;;  %v2652_v42 = vmul.f32 -0.5, %v4150_v36  ;;  %v2655_v21 = vand.u32 2147483647, %v4150_v36 }
 0x34b   :  { %4151 = vlog2.f32 %v2649_v37  ;;  %v2653_v38 = vadd.f32 1.0, %v2652_v42  ;;  %vm2656_vm1 = vcmp.lt.f32.partialorder %v2655_v21, 0.0004427343 }
 0x34d   :  { %v2654_v40 = vmul.f32 %v4150_v36, %v2653_v38 }
 0x351   :  { %v4152_v46 = vpop.eup %4151 }
 0x352   :  { %v2651_v39 = vmul.f32 0.6931472, %v4152_v46 }
 0x354   :  { %v2657_v41 = vsel %vm2656_vm1, %v2654_v40, %v2651_v39 }
 0x355   :  { %v2658_v43 = vsel %vm2646_vm2, %v2643_v34, %v2657_v41 }
 0x356   :  { %2659 = vst [vmem:[#allocation16] sm:$0xff] %v2658_v43 }
 0x357   :  { %2670 = dma.vmem_to_hbm [thread:$0]  %s2666_s19, 128, %s2668_s22, [#allocation4]  }
 0x358   :  { %4379 = dma.done.wait [#allocation4], 128  }
 0x359   :  { %4380 = vsyncadd [#allocation4], 4294967168 }
 0x35a   :  { %2675 = vsyncpa [#allocation3], 1 }
 0x35b   :  { %2676 = vsyncpa [#allocation6], 1 }
 0x35c   :  { %2677 = vsyncpa [#allocation9], 1 }
 0x35d   :  { %2678 = vsyncpa [#allocation12], 1 }
 0x35e   :  { %2679 = vsyncpa [#allocation15], 1 }
 0x35f   :  { %2680 = vsyncpa [#allocation4], 1 }

</bundles_post_ra>
